<compile_context>
chip_gen: v5e
topology: v5e:2x2
jax: 0.10.0
libtpu: 0.0.40
codegen_flags: <defaults>
</compile_context>

<pallas_src>
import functools

import jax
import jax.numpy as jnp
from jax import lax
from jax.experimental import pallas as pl
from jax.experimental.pallas import tpu as pltpu


# ----------------------------------------------------------------------------
# Fused kernel: embeddings-LN -> L x (QKV, attention, out-proj, LN, FFN, LN)
#               -> [CLS] -> fc1 -> ReLU -> fc2 -> softmax
# One grid step == one batch element.
# ----------------------------------------------------------------------------

def fused_bert_kernel(
    x_ref, mask_ref,
    emb_g_ref, emb_b_ref,
    wqkv_ref, bqkv_ref, wo_ref, bo_ref, ln1_g_ref, ln1_b_ref,
    wi_ref, bi_ref, wo2_ref, bo2_ref, ln2_g_ref, ln2_b_ref,
    cw1_ref, cb1_ref, cw2_ref, cb2_ref,
    o_ref,
    *, num_layers, num_heads, head_dim, num_classes,
):
    S, H = x_ref.shape
    scale = 1.0 / (head_dim ** 0.5)

    def layer_norm(x, g, b):
        # single-pass variance: E[x^2] - mean^2 (one fewer cross-lane pass)
        mean = jnp.mean(x, axis=-1, keepdims=True)
        msq = jnp.mean(x * x, axis=-1, keepdims=True)
        var = msq - mean * mean
        return (x - mean) * lax.rsqrt(var + 1e-5) * g + b

    def softmax_rows(s, approx):
        s = s - jnp.max(s, axis=-1, keepdims=True)
        p = jnp.exp(s)
        return p * pl.reciprocal(jnp.sum(p, axis=-1, keepdims=True), approx=approx)

    # --- embedding LayerNorm (no zero-residual DMA; plain LN) ---
    x = layer_norm(x_ref[...], emb_g_ref[...], emb_b_ref[...])

    # --- additive attention bias built in-kernel from the (1, S) mask ---
    bias = (1.0 - mask_ref[0]) * (-1e9)            # (1, S), broadcast over queries

    # --- encoder layers (weights stacked on a leading layer axis) ---
    for l in range(num_layers):
        wqkv = wqkv_ref[l]                         # (H, 3H)  fused Q|K|V weights
        qkv = jnp.dot(x, wqkv, preferred_element_type=jnp.float32) + bqkv_ref[l]
        wo = wo_ref[l]                             # (H, H)

        attn = None
        for h in range(num_heads):
            lo = h * head_dim
            hi = lo + head_dim
            qh = qkv[:, lo:hi]                     # (S, d)
            kh = qkv[:, H + lo:H + hi]             # (S, d)
            vh = qkv[:, 2 * H + lo:2 * H + hi]     # (S, d)
            # scores: contract head dims directly (no explicit transpose)
            s = lax.dot_general(qh, kh, (((1,), (1,)), ((), ())),
                                preferred_element_type=jnp.float32)
            s = s * scale + bias                   # (S, S)
            p = softmax_rows(s, approx=True)
            ctx_h = jnp.dot(p, vh, preferred_element_type=jnp.float32)   # (S, d)
            # fold the output projection per head: ctx @ Wo == sum_h ctx_h @ Wo[h]
            part = jnp.dot(ctx_h, wo[lo:hi, :],
                           preferred_element_type=jnp.float32)           # (S, H)
            attn = part if attn is None else attn + part
        attn = attn + bo_ref[l]
        # (attention-output dropout = identity in eval mode)
        x = layer_norm(attn + x, ln1_g_ref[l], ln1_b_ref[l])

        # --- feed-forward: intermediate -> GELU -> output ---
        hmid = jnp.dot(x, wi_ref[l], preferred_element_type=jnp.float32) + bi_ref[l]
        # TODO(synk): HF RoBERTa uses exact (erf) GELU; tanh approximation used here.
        hmid = 0.5 * hmid * (1.0 + jnp.tanh(
            0.7978845608028654 * (hmid + 0.044715 * hmid * hmid * hmid)))
        ff = jnp.dot(hmid, wo2_ref[l], preferred_element_type=jnp.float32) + bo2_ref[l]
        # (FFN-output dropout = identity in eval mode)
        x = layer_norm(ff + x, ln2_g_ref[l], ln2_b_ref[l])

    # --- classifier on the [CLS] token (sequence position 0) ---
    cls = x[0:1, :]                                # (1, H)
    h1 = jnp.dot(cls, cw1_ref[...], preferred_element_type=jnp.float32) + cb1_ref[...]
    # (classifier dropout = identity in eval mode)
    h1 = jnp.maximum(h1, 0.0)
    logits = jnp.dot(h1, cw2_ref[...], preferred_element_type=jnp.float32) + cb2_ref[...]
    # mask lane padding (columns >= num_classes) so the softmax ignores it
    col = lax.broadcasted_iota(jnp.int32, logits.shape, 1)
    logits = jnp.where(col < num_classes, logits, -1e30)
    probs = softmax_rows(logits, approx=False)     # exact divide for the head
    o_ref[0] = probs                               # lane-dense (1, 128) store


# ----------------------------------------------------------------------------
# Parameter initialization (deterministic synthetic weights; the real module
# loads 'FacebookAI/roberta-base' — no checkpoint loading here by design).
# QKV weights are pre-fused to (H, 3H); classifier is zero-padded to 128 lanes.
# ----------------------------------------------------------------------------

def init_params(key, *, vocab=64, max_pos=32, hidden=32, num_heads=4,
                intermediate=64, num_layers=2, num_classes=6,
                cls_hidden=100, cls_pad=128):
    keys = iter(jax.random.split(key, 8 * num_layers + 16))

    def nrm(shape):
        return jax.random.normal(next(keys), shape, jnp.float32) * 0.02

    wqkv, bqkv, wo, bo = [], [], [], []
    ln1_g, ln1_b, wi, bi, wo2, bo2, ln2_g, ln2_b = ([] for _ in range(8))
    for _ in range(num_layers):
        wqkv.append(jnp.concatenate([nrm((hidden, hidden)) for _ in range(3)], axis=1))
        bqkv.append(jnp.zeros((1, 3 * hidden), jnp.float32))
        wo.append(nrm((hidden, hidden)))
        bo.append(jnp.zeros((1, hidden), jnp.float32))
        ln1_g.append(jnp.ones((1, hidden), jnp.float32))
        ln1_b.append(jnp.zeros((1, hidden), jnp.float32))
        wi.append(nrm((hidden, intermediate)))
        bi.append(jnp.zeros((1, intermediate), jnp.float32))
        wo2.append(nrm((intermediate, hidden)))
        bo2.append(jnp.zeros((1, hidden), jnp.float32))
        ln2_g.append(jnp.ones((1, hidden), jnp.float32))
        ln2_b.append(jnp.zeros((1, hidden), jnp.float32))

    # Classifier: fc1 (hidden->100) and fc2 (100->6), zero-padded to 128 lanes
    # so every matmul column / vector store is lane-dense.  Padding is exact:
    # padded fc1 columns produce ReLU(0)=0, padded fc2 rows are zero.
    cls_w1 = jnp.zeros((hidden, cls_pad), jnp.float32)
    cls_w1 = cls_w1.at[:, :cls_hidden].set(nrm((hidden, cls_hidden)))
    cls_w2 = jnp.zeros((cls_pad, cls_pad), jnp.float32)
    cls_w2 = cls_w2.at[:cls_hidden, :num_classes].set(nrm((cls_hidden, num_classes)))

    params = {
        "num_heads": num_heads,
        "num_classes": num_classes,
        "word_emb": nrm((vocab, hidden)),
        "pos_emb": nrm((max_pos, hidden)),   # note: max_pos must stay >= S + 2
        "type_emb": nrm((1, hidden)),
        "emb_ln_g": jnp.ones((1, hidden), jnp.float32),
        "emb_ln_b": jnp.zeros((1, hidden), jnp.float32),
        "wqkv": jnp.stack(wqkv), "bqkv": jnp.stack(bqkv),
        "wo": jnp.stack(wo), "bo": jnp.stack(bo),
        "ln1_g": jnp.stack(ln1_g), "ln1_b": jnp.stack(ln1_b),
        "wi": jnp.stack(wi), "bi": jnp.stack(bi),
        "wo2": jnp.stack(wo2), "bo2": jnp.stack(bo2),
        "ln2_g": jnp.stack(ln2_g), "ln2_b": jnp.stack(ln2_b),
        "cls_w1": cls_w1,
        "cls_b1": jnp.zeros((1, cls_pad), jnp.float32),
        "cls_w2": cls_w2,
        "cls_b2": jnp.zeros((1, cls_pad), jnp.float32),
    }
    return params


# ----------------------------------------------------------------------------
# Forward pass:  MyBertModel.forward(input_id, mask)
#   sequence_output = RoBERTa(input_ids, mask)[0]
#   probs = Classifier(sequence_output[:, 0, :])
# ----------------------------------------------------------------------------

def my_bert_model_forward(params, input_ids, mask):
    B, S = input_ids.shape
    H = params["word_emb"].shape[1]
    nH = params["num_heads"]
    d = H // nH
    L = params["wqkv"].shape[0]
    nc = params["num_classes"]
    cls_pad = params["cls_w1"].shape[1]

    # --- embeddings (gather = glue) ---
    mask_i = mask.astype(jnp.int32)
    # RoBERTa-style position ids: cumsum of mask, offset by padding_idx=1.
    pos_ids = (jnp.cumsum(mask_i, axis=1) * mask_i) + 1
    x = (jnp.take(params["word_emb"], input_ids, axis=0)
         + jnp.take(params["pos_emb"], pos_ids, axis=0)
         + params["type_emb"][0][None, None, :])
    x2 = x.reshape(B * S, H).astype(jnp.float32)
    mask_f = mask.astype(jnp.float32).reshape(B, 1, S)

    weights = (
        params["emb_ln_g"], params["emb_ln_b"],
        params["wqkv"], params["bqkv"], params["wo"], params["bo"],
        params["ln1_g"], params["ln1_b"],
        params["wi"], params["bi"], params["wo2"], params["bo2"],
        params["ln2_g"], params["ln2_b"],
        params["cls_w1"], params["cls_b1"], params["cls_w2"], params["cls_b2"],
    )

    def full_spec(arr):
        # whole array resident in VMEM, same block every grid step
        return pl.BlockSpec(arr.shape, lambda b, _n=arr.ndim: (0,) * _n)

    kernel = functools.partial(
        fused_bert_kernel,
        num_layers=L, num_heads=nH, head_dim=d, num_classes=nc,
    )

    probs_padded = pl.pallas_call(
        kernel,
        out_shape=jax.ShapeDtypeStruct((B, 1, cls_pad), jnp.float32),
        grid=(B,),
        in_specs=[
            pl.BlockSpec((S, H), lambda b: (b, 0)),        # activations, per batch
            pl.BlockSpec((1, 1, S), lambda b: (b, 0, 0)),  # attention mask, per batch
        ] + [full_spec(w) for w in weights],
        out_specs=pl.BlockSpec((1, 1, cls_pad), lambda b: (b, 0, 0)),
        compiler_params=pltpu.CompilerParams(
            dimension_semantics=("parallel",)),            # 2-way megacore on v7x
    )(x2, mask_f, *weights)

    return probs_padded[:, 0, :nc]


# ----------------------------------------------------------------------------
# Demo
# ----------------------------------------------------------------------------

if __name__ == "__main__":
    key = jax.random.PRNGKey(0)
    pkey, ikey = jax.random.split(key)

    B, S = 2, 8
    params = init_params(pkey, vocab=64, max_pos=32, hidden=32, num_heads=4,
                         intermediate=64, num_layers=2, num_classes=6)

    input_id = jax.random.randint(ikey, (B, S), minval=3, maxval=64, dtype=jnp.int32)
    mask = jnp.ones((B, S), dtype=jnp.int32).at[1, S - 2:].set(0)  # pad tail of seq 1

    fwd = jax.jit(lambda ids, m: my_bert_model_forward(params, ids, m))
    probs = jax.block_until_ready(fwd(input_id, mask))

    assert probs.shape == (B, 6)
    # softmax rows must sum to 1 over the 6 real classes
    assert bool(jnp.all(jnp.abs(jnp.sum(probs, axis=1) - 1.0) < 1e-3))
    print("KERNEL_OK")
</pallas_src>

<mosaic_0001>
module attributes {stable_mosaic.version = 11 : i64} {
  func.func @fused_bert_kernel(%arg0: i32, %arg1: memref<8x32xf32, #tpu.memory_space<vmem>>, %arg2: memref<1x1x8xf32, #tpu.memory_space<vmem>>, %arg3: memref<1x32xf32, #tpu.memory_space<vmem>>, %arg4: memref<1x32xf32, #tpu.memory_space<vmem>>, %arg5: memref<2x32x96xf32, #tpu.memory_space<vmem>>, %arg6: memref<2x1x96xf32, #tpu.memory_space<vmem>>, %arg7: memref<2x32x32xf32, #tpu.memory_space<vmem>>, %arg8: memref<2x1x32xf32, #tpu.memory_space<vmem>>, %arg9: memref<2x1x32xf32, #tpu.memory_space<vmem>>, %arg10: memref<2x1x32xf32, #tpu.memory_space<vmem>>, %arg11: memref<2x32x64xf32, #tpu.memory_space<vmem>>, %arg12: memref<2x1x64xf32, #tpu.memory_space<vmem>>, %arg13: memref<2x64x32xf32, #tpu.memory_space<vmem>>, %arg14: memref<2x1x32xf32, #tpu.memory_space<vmem>>, %arg15: memref<2x1x32xf32, #tpu.memory_space<vmem>>, %arg16: memref<2x1x32xf32, #tpu.memory_space<vmem>>, %arg17: memref<32x128xf32, #tpu.memory_space<vmem>>, %arg18: memref<1x128xf32, #tpu.memory_space<vmem>>, %arg19: memref<128x128xf32, #tpu.memory_space<vmem>>, %arg20: memref<1x128xf32, #tpu.memory_space<vmem>>, %arg21: memref<1x1x128xf32, #tpu.memory_space<vmem>>) attributes {dimension_semantics = [#tpu.dimension_semantics<parallel>], iteration_bounds = array<i64: 2>, scalar_prefetch = 0 : i64, scratch_operands = 0 : i64, tpu.core_type = #tpu.core_type<tc>, window_params = [{transform_indices = @transform_0, window_bounds = array<i64: 8, 32>}, {transform_indices = @transform_1, window_bounds = array<i64: 1, 1, 8>}, {pipeline_mode = #tpu.pipeline_mode<synchronous>, transform_indices = @transform_2, window_bounds = array<i64: 1, 32>}, {pipeline_mode = #tpu.pipeline_mode<synchronous>, transform_indices = @transform_3, window_bounds = array<i64: 1, 32>}, {pipeline_mode = #tpu.pipeline_mode<synchronous>, transform_indices = @transform_4, window_bounds = array<i64: 2, 32, 96>}, {pipeline_mode = #tpu.pipeline_mode<synchronous>, transform_indices = @transform_5, window_bounds = array<i64: 2, 1, 96>}, {pipeline_mode = #tpu.pipeline_mode<synchronous>, transform_indices = @transform_6, window_bounds = array<i64: 2, 32, 32>}, {pipeline_mode = #tpu.pipeline_mode<synchronous>, transform_indices = @transform_7, window_bounds = array<i64: 2, 1, 32>}, {pipeline_mode = #tpu.pipeline_mode<synchronous>, transform_indices = @transform_8, window_bounds = array<i64: 2, 1, 32>}, {pipeline_mode = #tpu.pipeline_mode<synchronous>, transform_indices = @transform_9, window_bounds = array<i64: 2, 1, 32>}, {pipeline_mode = #tpu.pipeline_mode<synchronous>, transform_indices = @transform_10, window_bounds = array<i64: 2, 32, 64>}, {pipeline_mode = #tpu.pipeline_mode<synchronous>, transform_indices = @transform_11, window_bounds = array<i64: 2, 1, 64>}, {pipeline_mode = #tpu.pipeline_mode<synchronous>, transform_indices = @transform_12, window_bounds = array<i64: 2, 64, 32>}, {pipeline_mode = #tpu.pipeline_mode<synchronous>, transform_indices = @transform_13, window_bounds = array<i64: 2, 1, 32>}, {pipeline_mode = #tpu.pipeline_mode<synchronous>, transform_indices = @transform_14, window_bounds = array<i64: 2, 1, 32>}, {pipeline_mode = #tpu.pipeline_mode<synchronous>, transform_indices = @transform_15, window_bounds = array<i64: 2, 1, 32>}, {pipeline_mode = #tpu.pipeline_mode<synchronous>, transform_indices = @transform_16, window_bounds = array<i64: 32, 128>}, {pipeline_mode = #tpu.pipeline_mode<synchronous>, transform_indices = @transform_17, window_bounds = array<i64: 1, 128>}, {pipeline_mode = #tpu.pipeline_mode<synchronous>, transform_indices = @transform_18, window_bounds = array<i64: 128, 128>}, {pipeline_mode = #tpu.pipeline_mode<synchronous>, transform_indices = @transform_19, window_bounds = array<i64: 1, 128>}, {transform_indices = @transform_20, window_bounds = array<i64: 1, 1, 128>}]} {
    %c0 = arith.constant 0 : index
    %c0_0 = arith.constant 0 : index
    %0 = vector.load %arg1[%c0, %c0_0] : memref<8x32xf32, #tpu.memory_space<vmem>>, vector<8x32xf32>
    %c0_1 = arith.constant 0 : index
    %c0_2 = arith.constant 0 : index
    %1 = vector.load %arg3[%c0_1, %c0_2] : memref<1x32xf32, #tpu.memory_space<vmem>>, vector<1x32xf32>
    %c0_3 = arith.constant 0 : index
    %c0_4 = arith.constant 0 : index
    %2 = vector.load %arg4[%c0_3, %c0_4] : memref<1x32xf32, #tpu.memory_space<vmem>>, vector<1x32xf32>
    %cst = arith.constant dense<0.000000e+00> : vector<8xf32>
    %3 = vector.multi_reduction <add>, %0, %cst [1] : vector<8x32xf32> to vector<8xf32>
    %4 = vector.shape_cast %3 : vector<8xf32> to vector<8x1xf32>
    %cst_5 = arith.constant 3.200000e+01 : f32
    %5 = vector.broadcast %cst_5 : f32 to vector<8x1xf32>
    %6 = arith.divf %4, %5 : vector<8x1xf32>
    %7 = arith.mulf %0, %0 : vector<8x32xf32>
    %cst_6 = arith.constant dense<0.000000e+00> : vector<8xf32>
    %8 = vector.multi_reduction <add>, %7, %cst_6 [1] : vector<8x32xf32> to vector<8xf32>
    %9 = vector.shape_cast %8 : vector<8xf32> to vector<8x1xf32>
    %cst_7 = arith.constant 3.200000e+01 : f32
    %10 = vector.broadcast %cst_7 : f32 to vector<8x1xf32>
    %11 = arith.divf %9, %10 : vector<8x1xf32>
    %12 = arith.mulf %6, %6 : vector<8x1xf32>
    %13 = arith.subf %11, %12 : vector<8x1xf32>
    %14 = vector.broadcast %6 : vector<8x1xf32> to vector<8x32xf32>
    %15 = arith.subf %0, %14 : vector<8x32xf32>
    %cst_8 = arith.constant 9.99999974E-6 : f32
    %16 = vector.broadcast %cst_8 : f32 to vector<8x1xf32>
    %17 = arith.addf %13, %16 : vector<8x1xf32>
    %18 = math.rsqrt %17 : vector<8x1xf32>
    %19 = vector.broadcast %18 : vector<8x1xf32> to vector<8x32xf32>
    %20 = arith.mulf %15, %19 : vector<8x32xf32>
    %21 = vector.broadcast %1 : vector<1x32xf32> to vector<8x32xf32>
    %22 = arith.mulf %20, %21 : vector<8x32xf32>
    %23 = vector.broadcast %2 : vector<1x32xf32> to vector<8x32xf32>
    %24 = arith.addf %22, %23 : vector<8x32xf32>
    %c0_9 = arith.constant 0 : index
    %c0_10 = arith.constant 0 : index
    %c0_11 = arith.constant 0 : index
    %25 = vector.load %arg2[%c0_9, %c0_10, %c0_11] : memref<1x1x8xf32, #tpu.memory_space<vmem>>, vector<1x1x8xf32>
    %26 = vector.shape_cast %25 : vector<1x1x8xf32> to vector<1x8xf32>
    %cst_12 = arith.constant 1.000000e+00 : f32
    %27 = vector.broadcast %cst_12 : f32 to vector<1x8xf32>
    %28 = arith.subf %27, %26 : vector<1x8xf32>
    %cst_13 = arith.constant -1.000000e+09 : f32
    %29 = vector.broadcast %cst_13 : f32 to vector<1x8xf32>
    %30 = arith.mulf %28, %29 : vector<1x8xf32>
    %c0_14 = arith.constant 0 : index
    %c0_15 = arith.constant 0 : index
    %c0_16 = arith.constant 0 : index
    %31 = vector.load %arg5[%c0_14, %c0_15, %c0_16] : memref<2x32x96xf32, #tpu.memory_space<vmem>>, vector<1x32x96xf32>
    %32 = vector.shape_cast %31 : vector<1x32x96xf32> to vector<32x96xf32>
    %cst_17 = arith.constant dense<0.000000e+00> : vector<8x96xf32>
    %33 = tpu.matmul %24, %32, %cst_17 {dimension_numbers = #tpu.dot_dimension_numbers<[1], [0], [0], [1], [0, 0, 1, 1], [], []>} : vector<8x32xf32>, vector<32x96xf32>, vector<8x96xf32> -> vector<8x96xf32>
    %c0_18 = arith.constant 0 : index
    %c0_19 = arith.constant 0 : index
    %c0_20 = arith.constant 0 : index
    %34 = vector.load %arg6[%c0_18, %c0_19, %c0_20] : memref<2x1x96xf32, #tpu.memory_space<vmem>>, vector<1x1x96xf32>
    %35 = vector.shape_cast %34 : vector<1x1x96xf32> to vector<1x96xf32>
    %36 = vector.broadcast %35 : vector<1x96xf32> to vector<8x96xf32>
    %37 = arith.addf %33, %36 : vector<8x96xf32>
    %c0_21 = arith.constant 0 : index
    %c0_22 = arith.constant 0 : index
    %c0_23 = arith.constant 0 : index
    %38 = vector.load %arg7[%c0_21, %c0_22, %c0_23] : memref<2x32x32xf32, #tpu.memory_space<vmem>>, vector<1x32x32xf32>
    %39 = vector.shape_cast %38 : vector<1x32x32xf32> to vector<32x32xf32>
    %40 = vector.extract_strided_slice %37 {offsets = [0, 0], sizes = [8, 8], strides = [1, 1]} : vector<8x96xf32> to vector<8x8xf32>
    %41 = vector.extract_strided_slice %37 {offsets = [0, 32], sizes = [8, 8], strides = [1, 1]} : vector<8x96xf32> to vector<8x8xf32>
    %42 = vector.extract_strided_slice %37 {offsets = [0, 64], sizes = [8, 8], strides = [1, 1]} : vector<8x96xf32> to vector<8x8xf32>
    %cst_24 = arith.constant dense<0.000000e+00> : vector<8x8xf32>
    %43 = tpu.matmul %40, %41, %cst_24 {dimension_numbers = #tpu.dot_dimension_numbers<[1], [1], [0], [0], [0, 0, 1, 0], [], []>} : vector<8x8xf32>, vector<8x8xf32>, vector<8x8xf32> -> vector<8x8xf32>
    %cst_25 = arith.constant 0.353553385 : f32
    %44 = vector.broadcast %cst_25 : f32 to vector<8x8xf32>
    %45 = arith.mulf %43, %44 : vector<8x8xf32>
    %46 = vector.broadcast %30 : vector<1x8xf32> to vector<8x8xf32>
    %47 = arith.addf %45, %46 : vector<8x8xf32>
    %cst_26 = arith.constant dense<0xFF800000> : vector<8xf32>
    %48 = vector.multi_reduction <maximumf>, %47, %cst_26 [1] : vector<8x8xf32> to vector<8xf32>
    %49 = vector.shape_cast %48 : vector<8xf32> to vector<8x1xf32>
    %50 = vector.broadcast %49 : vector<8x1xf32> to vector<8x8xf32>
    %51 = arith.subf %47, %50 : vector<8x8xf32>
    %52 = math.exp %51 : vector<8x8xf32>
    %cst_27 = arith.constant dense<0.000000e+00> : vector<8xf32>
    %53 = vector.multi_reduction <add>, %52, %cst_27 [1] : vector<8x8xf32> to vector<8xf32>
    %54 = vector.shape_cast %53 : vector<8xf32> to vector<8x1xf32>
    %55 = tpu.reciprocal %54 {approx = true} : vector<8x1xf32> -> vector<8x1xf32>
    %56 = vector.broadcast %55 : vector<8x1xf32> to vector<8x8xf32>
    %57 = arith.mulf %52, %56 : vector<8x8xf32>
    %cst_28 = arith.constant dense<0.000000e+00> : vector<8x8xf32>
    %58 = tpu.matmul %57, %42, %cst_28 {dimension_numbers = #tpu.dot_dimension_numbers<[1], [0], [0], [1], [0, 0, 1, 1], [], []>} : vector<8x8xf32>, vector<8x8xf32>, vector<8x8xf32> -> vector<8x8xf32>
    %59 = vector.extract_strided_slice %39 {offsets = [0, 0], sizes = [8, 32], strides = [1, 1]} : vector<32x32xf32> to vector<8x32xf32>
    %cst_29 = arith.constant dense<0.000000e+00> : vector<8x32xf32>
    %60 = tpu.matmul %58, %59, %cst_29 {dimension_numbers = #tpu.dot_dimension_numbers<[1], [0], [0], [1], [0, 0, 1, 1], [], []>} : vector<8x8xf32>, vector<8x32xf32>, vector<8x32xf32> -> vector<8x32xf32>
    %61 = vector.extract_strided_slice %37 {offsets = [0, 8], sizes = [8, 8], strides = [1, 1]} : vector<8x96xf32> to vector<8x8xf32>
    %62 = vector.extract_strided_slice %37 {offsets = [0, 40], sizes = [8, 8], strides = [1, 1]} : vector<8x96xf32> to vector<8x8xf32>
    %63 = vector.extract_strided_slice %37 {offsets = [0, 72], sizes = [8, 8], strides = [1, 1]} : vector<8x96xf32> to vector<8x8xf32>
    %cst_30 = arith.constant dense<0.000000e+00> : vector<8x8xf32>
    %64 = tpu.matmul %61, %62, %cst_30 {dimension_numbers = #tpu.dot_dimension_numbers<[1], [1], [0], [0], [0, 0, 1, 0], [], []>} : vector<8x8xf32>, vector<8x8xf32>, vector<8x8xf32> -> vector<8x8xf32>
    %cst_31 = arith.constant 0.353553385 : f32
    %65 = vector.broadcast %cst_31 : f32 to vector<8x8xf32>
    %66 = arith.mulf %64, %65 : vector<8x8xf32>
    %67 = vector.broadcast %30 : vector<1x8xf32> to vector<8x8xf32>
    %68 = arith.addf %66, %67 : vector<8x8xf32>
    %cst_32 = arith.constant dense<0xFF800000> : vector<8xf32>
    %69 = vector.multi_reduction <maximumf>, %68, %cst_32 [1] : vector<8x8xf32> to vector<8xf32>
    %70 = vector.shape_cast %69 : vector<8xf32> to vector<8x1xf32>
    %71 = vector.broadcast %70 : vector<8x1xf32> to vector<8x8xf32>
    %72 = arith.subf %68, %71 : vector<8x8xf32>
    %73 = math.exp %72 : vector<8x8xf32>
    %cst_33 = arith.constant dense<0.000000e+00> : vector<8xf32>
    %74 = vector.multi_reduction <add>, %73, %cst_33 [1] : vector<8x8xf32> to vector<8xf32>
    %75 = vector.shape_cast %74 : vector<8xf32> to vector<8x1xf32>
    %76 = tpu.reciprocal %75 {approx = true} : vector<8x1xf32> -> vector<8x1xf32>
    %77 = vector.broadcast %76 : vector<8x1xf32> to vector<8x8xf32>
    %78 = arith.mulf %73, %77 : vector<8x8xf32>
    %cst_34 = arith.constant dense<0.000000e+00> : vector<8x8xf32>
    %79 = tpu.matmul %78, %63, %cst_34 {dimension_numbers = #tpu.dot_dimension_numbers<[1], [0], [0], [1], [0, 0, 1, 1], [], []>} : vector<8x8xf32>, vector<8x8xf32>, vector<8x8xf32> -> vector<8x8xf32>
    %80 = vector.extract_strided_slice %39 {offsets = [8, 0], sizes = [8, 32], strides = [1, 1]} : vector<32x32xf32> to vector<8x32xf32>
    %cst_35 = arith.constant dense<0.000000e+00> : vector<8x32xf32>
    %81 = tpu.matmul %79, %80, %cst_35 {dimension_numbers = #tpu.dot_dimension_numbers<[1], [0], [0], [1], [0, 0, 1, 1], [], []>} : vector<8x8xf32>, vector<8x32xf32>, vector<8x32xf32> -> vector<8x32xf32>
    %82 = arith.addf %60, %81 : vector<8x32xf32>
    %83 = vector.extract_strided_slice %37 {offsets = [0, 16], sizes = [8, 8], strides = [1, 1]} : vector<8x96xf32> to vector<8x8xf32>
    %84 = vector.extract_strided_slice %37 {offsets = [0, 48], sizes = [8, 8], strides = [1, 1]} : vector<8x96xf32> to vector<8x8xf32>
    %85 = vector.extract_strided_slice %37 {offsets = [0, 80], sizes = [8, 8], strides = [1, 1]} : vector<8x96xf32> to vector<8x8xf32>
    %cst_36 = arith.constant dense<0.000000e+00> : vector<8x8xf32>
    %86 = tpu.matmul %83, %84, %cst_36 {dimension_numbers = #tpu.dot_dimension_numbers<[1], [1], [0], [0], [0, 0, 1, 0], [], []>} : vector<8x8xf32>, vector<8x8xf32>, vector<8x8xf32> -> vector<8x8xf32>
    %cst_37 = arith.constant 0.353553385 : f32
    %87 = vector.broadcast %cst_37 : f32 to vector<8x8xf32>
    %88 = arith.mulf %86, %87 : vector<8x8xf32>
    %89 = vector.broadcast %30 : vector<1x8xf32> to vector<8x8xf32>
    %90 = arith.addf %88, %89 : vector<8x8xf32>
    %cst_38 = arith.constant dense<0xFF800000> : vector<8xf32>
    %91 = vector.multi_reduction <maximumf>, %90, %cst_38 [1] : vector<8x8xf32> to vector<8xf32>
    %92 = vector.shape_cast %91 : vector<8xf32> to vector<8x1xf32>
    %93 = vector.broadcast %92 : vector<8x1xf32> to vector<8x8xf32>
    %94 = arith.subf %90, %93 : vector<8x8xf32>
    %95 = math.exp %94 : vector<8x8xf32>
    %cst_39 = arith.constant dense<0.000000e+00> : vector<8xf32>
    %96 = vector.multi_reduction <add>, %95, %cst_39 [1] : vector<8x8xf32> to vector<8xf32>
    %97 = vector.shape_cast %96 : vector<8xf32> to vector<8x1xf32>
    %98 = tpu.reciprocal %97 {approx = true} : vector<8x1xf32> -> vector<8x1xf32>
    %99 = vector.broadcast %98 : vector<8x1xf32> to vector<8x8xf32>
    %100 = arith.mulf %95, %99 : vector<8x8xf32>
    %cst_40 = arith.constant dense<0.000000e+00> : vector<8x8xf32>
    %101 = tpu.matmul %100, %85, %cst_40 {dimension_numbers = #tpu.dot_dimension_numbers<[1], [0], [0], [1], [0, 0, 1, 1], [], []>} : vector<8x8xf32>, vector<8x8xf32>, vector<8x8xf32> -> vector<8x8xf32>
    %102 = vector.extract_strided_slice %39 {offsets = [16, 0], sizes = [8, 32], strides = [1, 1]} : vector<32x32xf32> to vector<8x32xf32>
    %cst_41 = arith.constant dense<0.000000e+00> : vector<8x32xf32>
    %103 = tpu.matmul %101, %102, %cst_41 {dimension_numbers = #tpu.dot_dimension_numbers<[1], [0], [0], [1], [0, 0, 1, 1], [], []>} : vector<8x8xf32>, vector<8x32xf32>, vector<8x32xf32> -> vector<8x32xf32>
    %104 = arith.addf %82, %103 : vector<8x32xf32>
    %105 = vector.extract_strided_slice %37 {offsets = [0, 24], sizes = [8, 8], strides = [1, 1]} : vector<8x96xf32> to vector<8x8xf32>
    %106 = vector.extract_strided_slice %37 {offsets = [0, 56], sizes = [8, 8], strides = [1, 1]} : vector<8x96xf32> to vector<8x8xf32>
    %107 = vector.extract_strided_slice %37 {offsets = [0, 88], sizes = [8, 8], strides = [1, 1]} : vector<8x96xf32> to vector<8x8xf32>
    %cst_42 = arith.constant dense<0.000000e+00> : vector<8x8xf32>
    %108 = tpu.matmul %105, %106, %cst_42 {dimension_numbers = #tpu.dot_dimension_numbers<[1], [1], [0], [0], [0, 0, 1, 0], [], []>} : vector<8x8xf32>, vector<8x8xf32>, vector<8x8xf32> -> vector<8x8xf32>
    %cst_43 = arith.constant 0.353553385 : f32
    %109 = vector.broadcast %cst_43 : f32 to vector<8x8xf32>
    %110 = arith.mulf %108, %109 : vector<8x8xf32>
    %111 = vector.broadcast %30 : vector<1x8xf32> to vector<8x8xf32>
    %112 = arith.addf %110, %111 : vector<8x8xf32>
    %cst_44 = arith.constant dense<0xFF800000> : vector<8xf32>
    %113 = vector.multi_reduction <maximumf>, %112, %cst_44 [1] : vector<8x8xf32> to vector<8xf32>
    %114 = vector.shape_cast %113 : vector<8xf32> to vector<8x1xf32>
    %115 = vector.broadcast %114 : vector<8x1xf32> to vector<8x8xf32>
    %116 = arith.subf %112, %115 : vector<8x8xf32>
    %117 = math.exp %116 : vector<8x8xf32>
    %cst_45 = arith.constant dense<0.000000e+00> : vector<8xf32>
    %118 = vector.multi_reduction <add>, %117, %cst_45 [1] : vector<8x8xf32> to vector<8xf32>
    %119 = vector.shape_cast %118 : vector<8xf32> to vector<8x1xf32>
    %120 = tpu.reciprocal %119 {approx = true} : vector<8x1xf32> -> vector<8x1xf32>
    %121 = vector.broadcast %120 : vector<8x1xf32> to vector<8x8xf32>
    %122 = arith.mulf %117, %121 : vector<8x8xf32>
    %cst_46 = arith.constant dense<0.000000e+00> : vector<8x8xf32>
    %123 = tpu.matmul %122, %107, %cst_46 {dimension_numbers = #tpu.dot_dimension_numbers<[1], [0], [0], [1], [0, 0, 1, 1], [], []>} : vector<8x8xf32>, vector<8x8xf32>, vector<8x8xf32> -> vector<8x8xf32>
    %124 = vector.extract_strided_slice %39 {offsets = [24, 0], sizes = [8, 32], strides = [1, 1]} : vector<32x32xf32> to vector<8x32xf32>
    %cst_47 = arith.constant dense<0.000000e+00> : vector<8x32xf32>
    %125 = tpu.matmul %123, %124, %cst_47 {dimension_numbers = #tpu.dot_dimension_numbers<[1], [0], [0], [1], [0, 0, 1, 1], [], []>} : vector<8x8xf32>, vector<8x32xf32>, vector<8x32xf32> -> vector<8x32xf32>
    %126 = arith.addf %104, %125 : vector<8x32xf32>
    %c0_48 = arith.constant 0 : index
    %c0_49 = arith.constant 0 : index
    %c0_50 = arith.constant 0 : index
    %127 = vector.load %arg8[%c0_48, %c0_49, %c0_50] : memref<2x1x32xf32, #tpu.memory_space<vmem>>, vector<1x1x32xf32>
    %128 = vector.shape_cast %127 : vector<1x1x32xf32> to vector<1x32xf32>
    %129 = vector.broadcast %128 : vector<1x32xf32> to vector<8x32xf32>
    %130 = arith.addf %126, %129 : vector<8x32xf32>
    %131 = arith.addf %130, %24 : vector<8x32xf32>
    %c0_51 = arith.constant 0 : index
    %c0_52 = arith.constant 0 : index
    %c0_53 = arith.constant 0 : index
    %132 = vector.load %arg9[%c0_51, %c0_52, %c0_53] : memref<2x1x32xf32, #tpu.memory_space<vmem>>, vector<1x1x32xf32>
    %133 = vector.shape_cast %132 : vector<1x1x32xf32> to vector<1x32xf32>
    %c0_54 = arith.constant 0 : index
    %c0_55 = arith.constant 0 : index
    %c0_56 = arith.constant 0 : index
    %134 = vector.load %arg10[%c0_54, %c0_55, %c0_56] : memref<2x1x32xf32, #tpu.memory_space<vmem>>, vector<1x1x32xf32>
    %135 = vector.shape_cast %134 : vector<1x1x32xf32> to vector<1x32xf32>
    %cst_57 = arith.constant dense<0.000000e+00> : vector<8xf32>
    %136 = vector.multi_reduction <add>, %131, %cst_57 [1] : vector<8x32xf32> to vector<8xf32>
    %137 = vector.shape_cast %136 : vector<8xf32> to vector<8x1xf32>
    %cst_58 = arith.constant 3.200000e+01 : f32
    %138 = vector.broadcast %cst_58 : f32 to vector<8x1xf32>
    %139 = arith.divf %137, %138 : vector<8x1xf32>
    %140 = arith.mulf %131, %131 : vector<8x32xf32>
    %cst_59 = arith.constant dense<0.000000e+00> : vector<8xf32>
    %141 = vector.multi_reduction <add>, %140, %cst_59 [1] : vector<8x32xf32> to vector<8xf32>
    %142 = vector.shape_cast %141 : vector<8xf32> to vector<8x1xf32>
    %cst_60 = arith.constant 3.200000e+01 : f32
    %143 = vector.broadcast %cst_60 : f32 to vector<8x1xf32>
    %144 = arith.divf %142, %143 : vector<8x1xf32>
    %145 = arith.mulf %139, %139 : vector<8x1xf32>
    %146 = arith.subf %144, %145 : vector<8x1xf32>
    %147 = vector.broadcast %139 : vector<8x1xf32> to vector<8x32xf32>
    %148 = arith.subf %131, %147 : vector<8x32xf32>
    %cst_61 = arith.constant 9.99999974E-6 : f32
    %149 = vector.broadcast %cst_61 : f32 to vector<8x1xf32>
    %150 = arith.addf %146, %149 : vector<8x1xf32>
    %151 = math.rsqrt %150 : vector<8x1xf32>
    %152 = vector.broadcast %151 : vector<8x1xf32> to vector<8x32xf32>
    %153 = arith.mulf %148, %152 : vector<8x32xf32>
    %154 = vector.broadcast %133 : vector<1x32xf32> to vector<8x32xf32>
    %155 = arith.mulf %153, %154 : vector<8x32xf32>
    %156 = vector.broadcast %135 : vector<1x32xf32> to vector<8x32xf32>
    %157 = arith.addf %155, %156 : vector<8x32xf32>
    %c0_62 = arith.constant 0 : index
    %c0_63 = arith.constant 0 : index
    %c0_64 = arith.constant 0 : index
    %158 = vector.load %arg11[%c0_62, %c0_63, %c0_64] : memref<2x32x64xf32, #tpu.memory_space<vmem>>, vector<1x32x64xf32>
    %159 = vector.shape_cast %158 : vector<1x32x64xf32> to vector<32x64xf32>
    %cst_65 = arith.constant dense<0.000000e+00> : vector<8x64xf32>
    %160 = tpu.matmul %157, %159, %cst_65 {dimension_numbers = #tpu.dot_dimension_numbers<[1], [0], [0], [1], [0, 0, 1, 1], [], []>} : vector<8x32xf32>, vector<32x64xf32>, vector<8x64xf32> -> vector<8x64xf32>
    %c0_66 = arith.constant 0 : index
    %c0_67 = arith.constant 0 : index
    %c0_68 = arith.constant 0 : index
    %161 = vector.load %arg12[%c0_66, %c0_67, %c0_68] : memref<2x1x64xf32, #tpu.memory_space<vmem>>, vector<1x1x64xf32>
    %162 = vector.shape_cast %161 : vector<1x1x64xf32> to vector<1x64xf32>
    %163 = vector.broadcast %162 : vector<1x64xf32> to vector<8x64xf32>
    %164 = arith.addf %160, %163 : vector<8x64xf32>
    %cst_69 = arith.constant 5.000000e-01 : f32
    %165 = vector.broadcast %cst_69 : f32 to vector<8x64xf32>
    %166 = arith.mulf %165, %164 : vector<8x64xf32>
    %cst_70 = arith.constant 4.471500e-02 : f32
    %167 = vector.broadcast %cst_70 : f32 to vector<8x64xf32>
    %168 = arith.mulf %167, %164 : vector<8x64xf32>
    %169 = arith.mulf %168, %164 : vector<8x64xf32>
    %170 = arith.mulf %169, %164 : vector<8x64xf32>
    %171 = arith.addf %164, %170 : vector<8x64xf32>
    %cst_71 = arith.constant 0.797884583 : f32
    %172 = vector.broadcast %cst_71 : f32 to vector<8x64xf32>
    %173 = arith.mulf %172, %171 : vector<8x64xf32>
    %174 = math.tanh %173 : vector<8x64xf32>
    %cst_72 = arith.constant 1.000000e+00 : f32
    %175 = vector.broadcast %cst_72 : f32 to vector<8x64xf32>
    %176 = arith.addf %175, %174 : vector<8x64xf32>
    %177 = arith.mulf %166, %176 : vector<8x64xf32>
    %c0_73 = arith.constant 0 : index
    %c0_74 = arith.constant 0 : index
    %c0_75 = arith.constant 0 : index
    %178 = vector.load %arg13[%c0_73, %c0_74, %c0_75] : memref<2x64x32xf32, #tpu.memory_space<vmem>>, vector<1x64x32xf32>
    %179 = vector.shape_cast %178 : vector<1x64x32xf32> to vector<64x32xf32>
    %cst_76 = arith.constant dense<0.000000e+00> : vector<8x32xf32>
    %180 = tpu.matmul %177, %179, %cst_76 {dimension_numbers = #tpu.dot_dimension_numbers<[1], [0], [0], [1], [0, 0, 1, 1], [], []>} : vector<8x64xf32>, vector<64x32xf32>, vector<8x32xf32> -> vector<8x32xf32>
    %c0_77 = arith.constant 0 : index
    %c0_78 = arith.constant 0 : index
    %c0_79 = arith.constant 0 : index
    %181 = vector.load %arg14[%c0_77, %c0_78, %c0_79] : memref<2x1x32xf32, #tpu.memory_space<vmem>>, vector<1x1x32xf32>
    %182 = vector.shape_cast %181 : vector<1x1x32xf32> to vector<1x32xf32>
    %183 = vector.broadcast %182 : vector<1x32xf32> to vector<8x32xf32>
    %184 = arith.addf %180, %183 : vector<8x32xf32>
    %185 = arith.addf %184, %157 : vector<8x32xf32>
    %c0_80 = arith.constant 0 : index
    %c0_81 = arith.constant 0 : index
    %c0_82 = arith.constant 0 : index
    %186 = vector.load %arg15[%c0_80, %c0_81, %c0_82] : memref<2x1x32xf32, #tpu.memory_space<vmem>>, vector<1x1x32xf32>
    %187 = vector.shape_cast %186 : vector<1x1x32xf32> to vector<1x32xf32>
    %c0_83 = arith.constant 0 : index
    %c0_84 = arith.constant 0 : index
    %c0_85 = arith.constant 0 : index
    %188 = vector.load %arg16[%c0_83, %c0_84, %c0_85] : memref<2x1x32xf32, #tpu.memory_space<vmem>>, vector<1x1x32xf32>
    %189 = vector.shape_cast %188 : vector<1x1x32xf32> to vector<1x32xf32>
    %cst_86 = arith.constant dense<0.000000e+00> : vector<8xf32>
    %190 = vector.multi_reduction <add>, %185, %cst_86 [1] : vector<8x32xf32> to vector<8xf32>
    %191 = vector.shape_cast %190 : vector<8xf32> to vector<8x1xf32>
    %cst_87 = arith.constant 3.200000e+01 : f32
    %192 = vector.broadcast %cst_87 : f32 to vector<8x1xf32>
    %193 = arith.divf %191, %192 : vector<8x1xf32>
    %194 = arith.mulf %185, %185 : vector<8x32xf32>
    %cst_88 = arith.constant dense<0.000000e+00> : vector<8xf32>
    %195 = vector.multi_reduction <add>, %194, %cst_88 [1] : vector<8x32xf32> to vector<8xf32>
    %196 = vector.shape_cast %195 : vector<8xf32> to vector<8x1xf32>
    %cst_89 = arith.constant 3.200000e+01 : f32
    %197 = vector.broadcast %cst_89 : f32 to vector<8x1xf32>
    %198 = arith.divf %196, %197 : vector<8x1xf32>
    %199 = arith.mulf %193, %193 : vector<8x1xf32>
    %200 = arith.subf %198, %199 : vector<8x1xf32>
    %201 = vector.broadcast %193 : vector<8x1xf32> to vector<8x32xf32>
    %202 = arith.subf %185, %201 : vector<8x32xf32>
    %cst_90 = arith.constant 9.99999974E-6 : f32
    %203 = vector.broadcast %cst_90 : f32 to vector<8x1xf32>
    %204 = arith.addf %200, %203 : vector<8x1xf32>
    %205 = math.rsqrt %204 : vector<8x1xf32>
    %206 = vector.broadcast %205 : vector<8x1xf32> to vector<8x32xf32>
    %207 = arith.mulf %202, %206 : vector<8x32xf32>
    %208 = vector.broadcast %187 : vector<1x32xf32> to vector<8x32xf32>
    %209 = arith.mulf %207, %208 : vector<8x32xf32>
    %210 = vector.broadcast %189 : vector<1x32xf32> to vector<8x32xf32>
    %211 = arith.addf %209, %210 : vector<8x32xf32>
    %c1 = arith.constant 1 : index
    %c0_91 = arith.constant 0 : index
    %c0_92 = arith.constant 0 : index
    %212 = vector.load %arg5[%c1, %c0_91, %c0_92] : memref<2x32x96xf32, #tpu.memory_space<vmem>>, vector<1x32x96xf32>
    %213 = vector.shape_cast %212 : vector<1x32x96xf32> to vector<32x96xf32>
    %cst_93 = arith.constant dense<0.000000e+00> : vector<8x96xf32>
    %214 = tpu.matmul %211, %213, %cst_93 {dimension_numbers = #tpu.dot_dimension_numbers<[1], [0], [0], [1], [0, 0, 1, 1], [], []>} : vector<8x32xf32>, vector<32x96xf32>, vector<8x96xf32> -> vector<8x96xf32>
    %c1_94 = arith.constant 1 : index
    %c0_95 = arith.constant 0 : index
    %c0_96 = arith.constant 0 : index
    %215 = vector.load %arg6[%c1_94, %c0_95, %c0_96] : memref<2x1x96xf32, #tpu.memory_space<vmem>>, vector<1x1x96xf32>
    %216 = vector.shape_cast %215 : vector<1x1x96xf32> to vector<1x96xf32>
    %217 = vector.broadcast %216 : vector<1x96xf32> to vector<8x96xf32>
    %218 = arith.addf %214, %217 : vector<8x96xf32>
    %c1_97 = arith.constant 1 : index
    %c0_98 = arith.constant 0 : index
    %c0_99 = arith.constant 0 : index
    %219 = vector.load %arg7[%c1_97, %c0_98, %c0_99] : memref<2x32x32xf32, #tpu.memory_space<vmem>>, vector<1x32x32xf32>
    %220 = vector.shape_cast %219 : vector<1x32x32xf32> to vector<32x32xf32>
    %221 = vector.extract_strided_slice %218 {offsets = [0, 0], sizes = [8, 8], strides = [1, 1]} : vector<8x96xf32> to vector<8x8xf32>
    %222 = vector.extract_strided_slice %218 {offsets = [0, 32], sizes = [8, 8], strides = [1, 1]} : vector<8x96xf32> to vector<8x8xf32>
    %223 = vector.extract_strided_slice %218 {offsets = [0, 64], sizes = [8, 8], strides = [1, 1]} : vector<8x96xf32> to vector<8x8xf32>
    %cst_100 = arith.constant dense<0.000000e+00> : vector<8x8xf32>
    %224 = tpu.matmul %221, %222, %cst_100 {dimension_numbers = #tpu.dot_dimension_numbers<[1], [1], [0], [0], [0, 0, 1, 0], [], []>} : vector<8x8xf32>, vector<8x8xf32>, vector<8x8xf32> -> vector<8x8xf32>
    %cst_101 = arith.constant 0.353553385 : f32
    %225 = vector.broadcast %cst_101 : f32 to vector<8x8xf32>
    %226 = arith.mulf %224, %225 : vector<8x8xf32>
    %227 = vector.broadcast %30 : vector<1x8xf32> to vector<8x8xf32>
    %228 = arith.addf %226, %227 : vector<8x8xf32>
    %cst_102 = arith.constant dense<0xFF800000> : vector<8xf32>
    %229 = vector.multi_reduction <maximumf>, %228, %cst_102 [1] : vector<8x8xf32> to vector<8xf32>
    %230 = vector.shape_cast %229 : vector<8xf32> to vector<8x1xf32>
    %231 = vector.broadcast %230 : vector<8x1xf32> to vector<8x8xf32>
    %232 = arith.subf %228, %231 : vector<8x8xf32>
    %233 = math.exp %232 : vector<8x8xf32>
    %cst_103 = arith.constant dense<0.000000e+00> : vector<8xf32>
    %234 = vector.multi_reduction <add>, %233, %cst_103 [1] : vector<8x8xf32> to vector<8xf32>
    %235 = vector.shape_cast %234 : vector<8xf32> to vector<8x1xf32>
    %236 = tpu.reciprocal %235 {approx = true} : vector<8x1xf32> -> vector<8x1xf32>
    %237 = vector.broadcast %236 : vector<8x1xf32> to vector<8x8xf32>
    %238 = arith.mulf %233, %237 : vector<8x8xf32>
    %cst_104 = arith.constant dense<0.000000e+00> : vector<8x8xf32>
    %239 = tpu.matmul %238, %223, %cst_104 {dimension_numbers = #tpu.dot_dimension_numbers<[1], [0], [0], [1], [0, 0, 1, 1], [], []>} : vector<8x8xf32>, vector<8x8xf32>, vector<8x8xf32> -> vector<8x8xf32>
    %240 = vector.extract_strided_slice %220 {offsets = [0, 0], sizes = [8, 32], strides = [1, 1]} : vector<32x32xf32> to vector<8x32xf32>
    %cst_105 = arith.constant dense<0.000000e+00> : vector<8x32xf32>
    %241 = tpu.matmul %239, %240, %cst_105 {dimension_numbers = #tpu.dot_dimension_numbers<[1], [0], [0], [1], [0, 0, 1, 1], [], []>} : vector<8x8xf32>, vector<8x32xf32>, vector<8x32xf32> -> vector<8x32xf32>
    %242 = vector.extract_strided_slice %218 {offsets = [0, 8], sizes = [8, 8], strides = [1, 1]} : vector<8x96xf32> to vector<8x8xf32>
    %243 = vector.extract_strided_slice %218 {offsets = [0, 40], sizes = [8, 8], strides = [1, 1]} : vector<8x96xf32> to vector<8x8xf32>
    %244 = vector.extract_strided_slice %218 {offsets = [0, 72], sizes = [8, 8], strides = [1, 1]} : vector<8x96xf32> to vector<8x8xf32>
    %cst_106 = arith.constant dense<0.000000e+00> : vector<8x8xf32>
    %245 = tpu.matmul %242, %243, %cst_106 {dimension_numbers = #tpu.dot_dimension_numbers<[1], [1], [0], [0], [0, 0, 1, 0], [], []>} : vector<8x8xf32>, vector<8x8xf32>, vector<8x8xf32> -> vector<8x8xf32>
    %cst_107 = arith.constant 0.353553385 : f32
    %246 = vector.broadcast %cst_107 : f32 to vector<8x8xf32>
    %247 = arith.mulf %245, %246 : vector<8x8xf32>
    %248 = vector.broadcast %30 : vector<1x8xf32> to vector<8x8xf32>
    %249 = arith.addf %247, %248 : vector<8x8xf32>
    %cst_108 = arith.constant dense<0xFF800000> : vector<8xf32>
    %250 = vector.multi_reduction <maximumf>, %249, %cst_108 [1] : vector<8x8xf32> to vector<8xf32>
    %251 = vector.shape_cast %250 : vector<8xf32> to vector<8x1xf32>
    %252 = vector.broadcast %251 : vector<8x1xf32> to vector<8x8xf32>
    %253 = arith.subf %249, %252 : vector<8x8xf32>
    %254 = math.exp %253 : vector<8x8xf32>
    %cst_109 = arith.constant dense<0.000000e+00> : vector<8xf32>
    %255 = vector.multi_reduction <add>, %254, %cst_109 [1] : vector<8x8xf32> to vector<8xf32>
    %256 = vector.shape_cast %255 : vector<8xf32> to vector<8x1xf32>
    %257 = tpu.reciprocal %256 {approx = true} : vector<8x1xf32> -> vector<8x1xf32>
    %258 = vector.broadcast %257 : vector<8x1xf32> to vector<8x8xf32>
    %259 = arith.mulf %254, %258 : vector<8x8xf32>
    %cst_110 = arith.constant dense<0.000000e+00> : vector<8x8xf32>
    %260 = tpu.matmul %259, %244, %cst_110 {dimension_numbers = #tpu.dot_dimension_numbers<[1], [0], [0], [1], [0, 0, 1, 1], [], []>} : vector<8x8xf32>, vector<8x8xf32>, vector<8x8xf32> -> vector<8x8xf32>
    %261 = vector.extract_strided_slice %220 {offsets = [8, 0], sizes = [8, 32], strides = [1, 1]} : vector<32x32xf32> to vector<8x32xf32>
    %cst_111 = arith.constant dense<0.000000e+00> : vector<8x32xf32>
    %262 = tpu.matmul %260, %261, %cst_111 {dimension_numbers = #tpu.dot_dimension_numbers<[1], [0], [0], [1], [0, 0, 1, 1], [], []>} : vector<8x8xf32>, vector<8x32xf32>, vector<8x32xf32> -> vector<8x32xf32>
    %263 = arith.addf %241, %262 : vector<8x32xf32>
    %264 = vector.extract_strided_slice %218 {offsets = [0, 16], sizes = [8, 8], strides = [1, 1]} : vector<8x96xf32> to vector<8x8xf32>
    %265 = vector.extract_strided_slice %218 {offsets = [0, 48], sizes = [8, 8], strides = [1, 1]} : vector<8x96xf32> to vector<8x8xf32>
    %266 = vector.extract_strided_slice %218 {offsets = [0, 80], sizes = [8, 8], strides = [1, 1]} : vector<8x96xf32> to vector<8x8xf32>
    %cst_112 = arith.constant dense<0.000000e+00> : vector<8x8xf32>
    %267 = tpu.matmul %264, %265, %cst_112 {dimension_numbers = #tpu.dot_dimension_numbers<[1], [1], [0], [0], [0, 0, 1, 0], [], []>} : vector<8x8xf32>, vector<8x8xf32>, vector<8x8xf32> -> vector<8x8xf32>
    %cst_113 = arith.constant 0.353553385 : f32
    %268 = vector.broadcast %cst_113 : f32 to vector<8x8xf32>
    %269 = arith.mulf %267, %268 : vector<8x8xf32>
    %270 = vector.broadcast %30 : vector<1x8xf32> to vector<8x8xf32>
    %271 = arith.addf %269, %270 : vector<8x8xf32>
    %cst_114 = arith.constant dense<0xFF800000> : vector<8xf32>
    %272 = vector.multi_reduction <maximumf>, %271, %cst_114 [1] : vector<8x8xf32> to vector<8xf32>
    %273 = vector.shape_cast %272 : vector<8xf32> to vector<8x1xf32>
    %274 = vector.broadcast %273 : vector<8x1xf32> to vector<8x8xf32>
    %275 = arith.subf %271, %274 : vector<8x8xf32>
    %276 = math.exp %275 : vector<8x8xf32>
    %cst_115 = arith.constant dense<0.000000e+00> : vector<8xf32>
    %277 = vector.multi_reduction <add>, %276, %cst_115 [1] : vector<8x8xf32> to vector<8xf32>
    %278 = vector.shape_cast %277 : vector<8xf32> to vector<8x1xf32>
    %279 = tpu.reciprocal %278 {approx = true} : vector<8x1xf32> -> vector<8x1xf32>
    %280 = vector.broadcast %279 : vector<8x1xf32> to vector<8x8xf32>
    %281 = arith.mulf %276, %280 : vector<8x8xf32>
    %cst_116 = arith.constant dense<0.000000e+00> : vector<8x8xf32>
    %282 = tpu.matmul %281, %266, %cst_116 {dimension_numbers = #tpu.dot_dimension_numbers<[1], [0], [0], [1], [0, 0, 1, 1], [], []>} : vector<8x8xf32>, vector<8x8xf32>, vector<8x8xf32> -> vector<8x8xf32>
    %283 = vector.extract_strided_slice %220 {offsets = [16, 0], sizes = [8, 32], strides = [1, 1]} : vector<32x32xf32> to vector<8x32xf32>
    %cst_117 = arith.constant dense<0.000000e+00> : vector<8x32xf32>
    %284 = tpu.matmul %282, %283, %cst_117 {dimension_numbers = #tpu.dot_dimension_numbers<[1], [0], [0], [1], [0, 0, 1, 1], [], []>} : vector<8x8xf32>, vector<8x32xf32>, vector<8x32xf32> -> vector<8x32xf32>
    %285 = arith.addf %263, %284 : vector<8x32xf32>
    %286 = vector.extract_strided_slice %218 {offsets = [0, 24], sizes = [8, 8], strides = [1, 1]} : vector<8x96xf32> to vector<8x8xf32>
    %287 = vector.extract_strided_slice %218 {offsets = [0, 56], sizes = [8, 8], strides = [1, 1]} : vector<8x96xf32> to vector<8x8xf32>
    %288 = vector.extract_strided_slice %218 {offsets = [0, 88], sizes = [8, 8], strides = [1, 1]} : vector<8x96xf32> to vector<8x8xf32>
    %cst_118 = arith.constant dense<0.000000e+00> : vector<8x8xf32>
    %289 = tpu.matmul %286, %287, %cst_118 {dimension_numbers = #tpu.dot_dimension_numbers<[1], [1], [0], [0], [0, 0, 1, 0], [], []>} : vector<8x8xf32>, vector<8x8xf32>, vector<8x8xf32> -> vector<8x8xf32>
    %cst_119 = arith.constant 0.353553385 : f32
    %290 = vector.broadcast %cst_119 : f32 to vector<8x8xf32>
    %291 = arith.mulf %289, %290 : vector<8x8xf32>
    %292 = vector.broadcast %30 : vector<1x8xf32> to vector<8x8xf32>
    %293 = arith.addf %291, %292 : vector<8x8xf32>
    %cst_120 = arith.constant dense<0xFF800000> : vector<8xf32>
    %294 = vector.multi_reduction <maximumf>, %293, %cst_120 [1] : vector<8x8xf32> to vector<8xf32>
    %295 = vector.shape_cast %294 : vector<8xf32> to vector<8x1xf32>
    %296 = vector.broadcast %295 : vector<8x1xf32> to vector<8x8xf32>
    %297 = arith.subf %293, %296 : vector<8x8xf32>
    %298 = math.exp %297 : vector<8x8xf32>
    %cst_121 = arith.constant dense<0.000000e+00> : vector<8xf32>
    %299 = vector.multi_reduction <add>, %298, %cst_121 [1] : vector<8x8xf32> to vector<8xf32>
    %300 = vector.shape_cast %299 : vector<8xf32> to vector<8x1xf32>
    %301 = tpu.reciprocal %300 {approx = true} : vector<8x1xf32> -> vector<8x1xf32>
    %302 = vector.broadcast %301 : vector<8x1xf32> to vector<8x8xf32>
    %303 = arith.mulf %298, %302 : vector<8x8xf32>
    %cst_122 = arith.constant dense<0.000000e+00> : vector<8x8xf32>
    %304 = tpu.matmul %303, %288, %cst_122 {dimension_numbers = #tpu.dot_dimension_numbers<[1], [0], [0], [1], [0, 0, 1, 1], [], []>} : vector<8x8xf32>, vector<8x8xf32>, vector<8x8xf32> -> vector<8x8xf32>
    %305 = vector.extract_strided_slice %220 {offsets = [24, 0], sizes = [8, 32], strides = [1, 1]} : vector<32x32xf32> to vector<8x32xf32>
    %cst_123 = arith.constant dense<0.000000e+00> : vector<8x32xf32>
    %306 = tpu.matmul %304, %305, %cst_123 {dimension_numbers = #tpu.dot_dimension_numbers<[1], [0], [0], [1], [0, 0, 1, 1], [], []>} : vector<8x8xf32>, vector<8x32xf32>, vector<8x32xf32> -> vector<8x32xf32>
    %307 = arith.addf %285, %306 : vector<8x32xf32>
    %c1_124 = arith.constant 1 : index
    %c0_125 = arith.constant 0 : index
    %c0_126 = arith.constant 0 : index
    %308 = vector.load %arg8[%c1_124, %c0_125, %c0_126] : memref<2x1x32xf32, #tpu.memory_space<vmem>>, vector<1x1x32xf32>
    %309 = vector.shape_cast %308 : vector<1x1x32xf32> to vector<1x32xf32>
    %310 = vector.broadcast %309 : vector<1x32xf32> to vector<8x32xf32>
    %311 = arith.addf %307, %310 : vector<8x32xf32>
    %312 = arith.addf %311, %211 : vector<8x32xf32>
    %c1_127 = arith.constant 1 : index
    %c0_128 = arith.constant 0 : index
    %c0_129 = arith.constant 0 : index
    %313 = vector.load %arg9[%c1_127, %c0_128, %c0_129] : memref<2x1x32xf32, #tpu.memory_space<vmem>>, vector<1x1x32xf32>
    %314 = vector.shape_cast %313 : vector<1x1x32xf32> to vector<1x32xf32>
    %c1_130 = arith.constant 1 : index
    %c0_131 = arith.constant 0 : index
    %c0_132 = arith.constant 0 : index
    %315 = vector.load %arg10[%c1_130, %c0_131, %c0_132] : memref<2x1x32xf32, #tpu.memory_space<vmem>>, vector<1x1x32xf32>
    %316 = vector.shape_cast %315 : vector<1x1x32xf32> to vector<1x32xf32>
    %cst_133 = arith.constant dense<0.000000e+00> : vector<8xf32>
    %317 = vector.multi_reduction <add>, %312, %cst_133 [1] : vector<8x32xf32> to vector<8xf32>
    %318 = vector.shape_cast %317 : vector<8xf32> to vector<8x1xf32>
    %cst_134 = arith.constant 3.200000e+01 : f32
    %319 = vector.broadcast %cst_134 : f32 to vector<8x1xf32>
    %320 = arith.divf %318, %319 : vector<8x1xf32>
    %321 = arith.mulf %312, %312 : vector<8x32xf32>
    %cst_135 = arith.constant dense<0.000000e+00> : vector<8xf32>
    %322 = vector.multi_reduction <add>, %321, %cst_135 [1] : vector<8x32xf32> to vector<8xf32>
    %323 = vector.shape_cast %322 : vector<8xf32> to vector<8x1xf32>
    %cst_136 = arith.constant 3.200000e+01 : f32
    %324 = vector.broadcast %cst_136 : f32 to vector<8x1xf32>
    %325 = arith.divf %323, %324 : vector<8x1xf32>
    %326 = arith.mulf %320, %320 : vector<8x1xf32>
    %327 = arith.subf %325, %326 : vector<8x1xf32>
    %328 = vector.broadcast %320 : vector<8x1xf32> to vector<8x32xf32>
    %329 = arith.subf %312, %328 : vector<8x32xf32>
    %cst_137 = arith.constant 9.99999974E-6 : f32
    %330 = vector.broadcast %cst_137 : f32 to vector<8x1xf32>
    %331 = arith.addf %327, %330 : vector<8x1xf32>
    %332 = math.rsqrt %331 : vector<8x1xf32>
    %333 = vector.broadcast %332 : vector<8x1xf32> to vector<8x32xf32>
    %334 = arith.mulf %329, %333 : vector<8x32xf32>
    %335 = vector.broadcast %314 : vector<1x32xf32> to vector<8x32xf32>
    %336 = arith.mulf %334, %335 : vector<8x32xf32>
    %337 = vector.broadcast %316 : vector<1x32xf32> to vector<8x32xf32>
    %338 = arith.addf %336, %337 : vector<8x32xf32>
    %c1_138 = arith.constant 1 : index
    %c0_139 = arith.constant 0 : index
    %c0_140 = arith.constant 0 : index
    %339 = vector.load %arg11[%c1_138, %c0_139, %c0_140] : memref<2x32x64xf32, #tpu.memory_space<vmem>>, vector<1x32x64xf32>
    %340 = vector.shape_cast %339 : vector<1x32x64xf32> to vector<32x64xf32>
    %cst_141 = arith.constant dense<0.000000e+00> : vector<8x64xf32>
    %341 = tpu.matmul %338, %340, %cst_141 {dimension_numbers = #tpu.dot_dimension_numbers<[1], [0], [0], [1], [0, 0, 1, 1], [], []>} : vector<8x32xf32>, vector<32x64xf32>, vector<8x64xf32> -> vector<8x64xf32>
    %c1_142 = arith.constant 1 : index
    %c0_143 = arith.constant 0 : index
    %c0_144 = arith.constant 0 : index
    %342 = vector.load %arg12[%c1_142, %c0_143, %c0_144] : memref<2x1x64xf32, #tpu.memory_space<vmem>>, vector<1x1x64xf32>
    %343 = vector.shape_cast %342 : vector<1x1x64xf32> to vector<1x64xf32>
    %344 = vector.broadcast %343 : vector<1x64xf32> to vector<8x64xf32>
    %345 = arith.addf %341, %344 : vector<8x64xf32>
    %cst_145 = arith.constant 5.000000e-01 : f32
    %346 = vector.broadcast %cst_145 : f32 to vector<8x64xf32>
    %347 = arith.mulf %346, %345 : vector<8x64xf32>
    %cst_146 = arith.constant 4.471500e-02 : f32
    %348 = vector.broadcast %cst_146 : f32 to vector<8x64xf32>
    %349 = arith.mulf %348, %345 : vector<8x64xf32>
    %350 = arith.mulf %349, %345 : vector<8x64xf32>
    %351 = arith.mulf %350, %345 : vector<8x64xf32>
    %352 = arith.addf %345, %351 : vector<8x64xf32>
    %cst_147 = arith.constant 0.797884583 : f32
    %353 = vector.broadcast %cst_147 : f32 to vector<8x64xf32>
    %354 = arith.mulf %353, %352 : vector<8x64xf32>
    %355 = math.tanh %354 : vector<8x64xf32>
    %cst_148 = arith.constant 1.000000e+00 : f32
    %356 = vector.broadcast %cst_148 : f32 to vector<8x64xf32>
    %357 = arith.addf %356, %355 : vector<8x64xf32>
    %358 = arith.mulf %347, %357 : vector<8x64xf32>
    %c1_149 = arith.constant 1 : index
    %c0_150 = arith.constant 0 : index
    %c0_151 = arith.constant 0 : index
    %359 = vector.load %arg13[%c1_149, %c0_150, %c0_151] : memref<2x64x32xf32, #tpu.memory_space<vmem>>, vector<1x64x32xf32>
    %360 = vector.shape_cast %359 : vector<1x64x32xf32> to vector<64x32xf32>
    %cst_152 = arith.constant dense<0.000000e+00> : vector<8x32xf32>
    %361 = tpu.matmul %358, %360, %cst_152 {dimension_numbers = #tpu.dot_dimension_numbers<[1], [0], [0], [1], [0, 0, 1, 1], [], []>} : vector<8x64xf32>, vector<64x32xf32>, vector<8x32xf32> -> vector<8x32xf32>
    %c1_153 = arith.constant 1 : index
    %c0_154 = arith.constant 0 : index
    %c0_155 = arith.constant 0 : index
    %362 = vector.load %arg14[%c1_153, %c0_154, %c0_155] : memref<2x1x32xf32, #tpu.memory_space<vmem>>, vector<1x1x32xf32>
    %363 = vector.shape_cast %362 : vector<1x1x32xf32> to vector<1x32xf32>
    %364 = vector.broadcast %363 : vector<1x32xf32> to vector<8x32xf32>
    %365 = arith.addf %361, %364 : vector<8x32xf32>
    %366 = arith.addf %365, %338 : vector<8x32xf32>
    %c1_156 = arith.constant 1 : index
    %c0_157 = arith.constant 0 : index
    %c0_158 = arith.constant 0 : index
    %367 = vector.load %arg15[%c1_156, %c0_157, %c0_158] : memref<2x1x32xf32, #tpu.memory_space<vmem>>, vector<1x1x32xf32>
    %368 = vector.shape_cast %367 : vector<1x1x32xf32> to vector<1x32xf32>
    %c1_159 = arith.constant 1 : index
    %c0_160 = arith.constant 0 : index
    %c0_161 = arith.constant 0 : index
    %369 = vector.load %arg16[%c1_159, %c0_160, %c0_161] : memref<2x1x32xf32, #tpu.memory_space<vmem>>, vector<1x1x32xf32>
    %370 = vector.shape_cast %369 : vector<1x1x32xf32> to vector<1x32xf32>
    %cst_162 = arith.constant dense<0.000000e+00> : vector<8xf32>
    %371 = vector.multi_reduction <add>, %366, %cst_162 [1] : vector<8x32xf32> to vector<8xf32>
    %372 = vector.shape_cast %371 : vector<8xf32> to vector<8x1xf32>
    %cst_163 = arith.constant 3.200000e+01 : f32
    %373 = vector.broadcast %cst_163 : f32 to vector<8x1xf32>
    %374 = arith.divf %372, %373 : vector<8x1xf32>
    %375 = arith.mulf %366, %366 : vector<8x32xf32>
    %cst_164 = arith.constant dense<0.000000e+00> : vector<8xf32>
    %376 = vector.multi_reduction <add>, %375, %cst_164 [1] : vector<8x32xf32> to vector<8xf32>
    %377 = vector.shape_cast %376 : vector<8xf32> to vector<8x1xf32>
    %cst_165 = arith.constant 3.200000e+01 : f32
    %378 = vector.broadcast %cst_165 : f32 to vector<8x1xf32>
    %379 = arith.divf %377, %378 : vector<8x1xf32>
    %380 = arith.mulf %374, %374 : vector<8x1xf32>
    %381 = arith.subf %379, %380 : vector<8x1xf32>
    %382 = vector.broadcast %374 : vector<8x1xf32> to vector<8x32xf32>
    %383 = arith.subf %366, %382 : vector<8x32xf32>
    %cst_166 = arith.constant 9.99999974E-6 : f32
    %384 = vector.broadcast %cst_166 : f32 to vector<8x1xf32>
    %385 = arith.addf %381, %384 : vector<8x1xf32>
    %386 = math.rsqrt %385 : vector<8x1xf32>
    %387 = vector.broadcast %386 : vector<8x1xf32> to vector<8x32xf32>
    %388 = arith.mulf %383, %387 : vector<8x32xf32>
    %389 = vector.broadcast %368 : vector<1x32xf32> to vector<8x32xf32>
    %390 = arith.mulf %388, %389 : vector<8x32xf32>
    %391 = vector.broadcast %370 : vector<1x32xf32> to vector<8x32xf32>
    %392 = arith.addf %390, %391 : vector<8x32xf32>
    %393 = vector.extract_strided_slice %392 {offsets = [0, 0], sizes = [1, 32], strides = [1, 1]} : vector<8x32xf32> to vector<1x32xf32>
    %c0_167 = arith.constant 0 : index
    %c0_168 = arith.constant 0 : index
    %394 = vector.load %arg17[%c0_167, %c0_168] : memref<32x128xf32, #tpu.memory_space<vmem>>, vector<32x128xf32>
    %cst_169 = arith.constant dense<0.000000e+00> : vector<1x128xf32>
    %395 = tpu.matmul %393, %394, %cst_169 {dimension_numbers = #tpu.dot_dimension_numbers<[1], [0], [0], [1], [0, 0, 1, 1], [], []>} : vector<1x32xf32>, vector<32x128xf32>, vector<1x128xf32> -> vector<1x128xf32>
    %c0_170 = arith.constant 0 : index
    %c0_171 = arith.constant 0 : index
    %396 = vector.load %arg18[%c0_170, %c0_171] : memref<1x128xf32, #tpu.memory_space<vmem>>, vector<1x128xf32>
    %397 = arith.addf %395, %396 : vector<1x128xf32>
    %cst_172 = arith.constant 0.000000e+00 : f32
    %398 = vector.broadcast %cst_172 : f32 to vector<1x128xf32>
    %399 = arith.maximumf %397, %398 : vector<1x128xf32>
    %c0_173 = arith.constant 0 : index
    %c0_174 = arith.constant 0 : index
    %400 = vector.load %arg19[%c0_173, %c0_174] : memref<128x128xf32, #tpu.memory_space<vmem>>, vector<128x128xf32>
    %cst_175 = arith.constant dense<0.000000e+00> : vector<1x128xf32>
    %401 = tpu.matmul %399, %400, %cst_175 {dimension_numbers = #tpu.dot_dimension_numbers<[1], [0], [0], [1], [0, 0, 1, 1], [], []>} : vector<1x128xf32>, vector<128x128xf32>, vector<1x128xf32> -> vector<1x128xf32>
    %c0_176 = arith.constant 0 : index
    %c0_177 = arith.constant 0 : index
    %402 = vector.load %arg20[%c0_176, %c0_177] : memref<1x128xf32, #tpu.memory_space<vmem>>, vector<1x128xf32>
    %403 = arith.addf %401, %402 : vector<1x128xf32>
    %404 = tpu.iota {dimensions = array<i32: 1>} : vector<1x128xi32>
    %c6_i32 = arith.constant 6 : i32
    %405 = vector.broadcast %c6_i32 : i32 to vector<1x128xi32>
    %406 = arith.cmpi slt, %404, %405 : vector<1x128xi32>
    %cst_178 = arith.constant -1.000000e+30 : f32
    %407 = vector.broadcast %cst_178 : f32 to vector<1x128xf32>
    %408 = arith.select %406, %403, %407 : vector<1x128xi1>, vector<1x128xf32>
    %cst_179 = arith.constant dense<0xFF800000> : vector<1xf32>
    %409 = vector.multi_reduction <maximumf>, %408, %cst_179 [1] : vector<1x128xf32> to vector<1xf32>
    %410 = vector.shape_cast %409 : vector<1xf32> to vector<1x1xf32>
    %411 = vector.broadcast %410 : vector<1x1xf32> to vector<1x128xf32>
    %412 = arith.subf %408, %411 : vector<1x128xf32>
    %413 = math.exp %412 : vector<1x128xf32>
    %cst_180 = arith.constant dense<0.000000e+00> : vector<1xf32>
    %414 = vector.multi_reduction <add>, %413, %cst_180 [1] : vector<1x128xf32> to vector<1xf32>
    %415 = vector.shape_cast %414 : vector<1xf32> to vector<1x1xf32>
    %416 = tpu.reciprocal %415 : vector<1x1xf32> -> vector<1x1xf32>
    %417 = vector.broadcast %416 : vector<1x1xf32> to vector<1x128xf32>
    %418 = arith.mulf %413, %417 : vector<1x128xf32>
    %c0_181 = arith.constant 0 : index
    %c0_182 = arith.constant 0 : index
    %c0_183 = arith.constant 0 : index
    %419 = vector.load %arg21[%c0_181, %c0_182, %c0_183] : memref<1x1x128xf32, #tpu.memory_space<vmem>>, vector<1x1x128xf32>
    %420 = vector.shape_cast %419 : vector<1x1x128xf32> to vector<1x128xf32>
    %421 = vector.shape_cast %418 : vector<1x128xf32> to vector<1x1x128xf32>
    tpu.vector_store %arg21[%c0_181, %c0_182, %c0_183], %421 {strides = array<i32>} : memref<1x1x128xf32, #tpu.memory_space<vmem>>, vector<1x1x128xf32>,
    return
  }
  func.func @transform_0(%arg0: i32) -> (i32, i32) {
    %c0_i32 = arith.constant 0 : i32
    %c0_i32_0 = arith.constant 0 : i32
    return %arg0, %c0_i32 : i32, i32
  }
  func.func @transform_1(%arg0: i32) -> (i32, i32, i32) {
    %c0_i32 = arith.constant 0 : i32
    %c0_i32_0 = arith.constant 0 : i32
    %c0_i32_1 = arith.constant 0 : i32
    return %arg0, %c0_i32, %c0_i32_0 : i32, i32, i32
  }
  func.func @transform_2(%arg0: i32) -> (i32, i32) {
    %c0_i32 = arith.constant 0 : i32
    %c0_i32_0 = arith.constant 0 : i32
    %c0_i32_1 = arith.constant 0 : i32
    return %c0_i32, %c0_i32_0 : i32, i32
  }
  func.func @transform_3(%arg0: i32) -> (i32, i32) {
    %c0_i32 = arith.constant 0 : i32
    %c0_i32_0 = arith.constant 0 : i32
    %c0_i32_1 = arith.constant 0 : i32
    return %c0_i32, %c0_i32_0 : i32, i32
  }
  func.func @transform_4(%arg0: i32) -> (i32, i32, i32) {
    %c0_i32 = arith.constant 0 : i32
    %c0_i32_0 = arith.constant 0 : i32
    %c0_i32_1 = arith.constant 0 : i32
    %c0_i32_2 = arith.constant 0 : i32
    return %c0_i32, %c0_i32_0, %c0_i32_1 : i32, i32, i32
  }
  func.func @transform_5(%arg0: i32) -> (i32, i32, i32) {
    %c0_i32 = arith.constant 0 : i32
    %c0_i32_0 = arith.constant 0 : i32
    %c0_i32_1 = arith.constant 0 : i32
    %c0_i32_2 = arith.constant 0 : i32
    return %c0_i32, %c0_i32_0, %c0_i32_1 : i32, i32, i32
  }
  func.func @transform_6(%arg0: i32) -> (i32, i32, i32) {
    %c0_i32 = arith.constant 0 : i32
    %c0_i32_0 = arith.constant 0 : i32
    %c0_i32_1 = arith.constant 0 : i32
    %c0_i32_2 = arith.constant 0 : i32
    return %c0_i32, %c0_i32_0, %c0_i32_1 : i32, i32, i32
  }
  func.func @transform_7(%arg0: i32) -> (i32, i32, i32) {
    %c0_i32 = arith.constant 0 : i32
    %c0_i32_0 = arith.constant 0 : i32
    %c0_i32_1 = arith.constant 0 : i32
    %c0_i32_2 = arith.constant 0 : i32
    return %c0_i32, %c0_i32_0, %c0_i32_1 : i32, i32, i32
  }
  func.func @transform_8(%arg0: i32) -> (i32, i32, i32) {
    %c0_i32 = arith.constant 0 : i32
    %c0_i32_0 = arith.constant 0 : i32
    %c0_i32_1 = arith.constant 0 : i32
    %c0_i32_2 = arith.constant 0 : i32
    return %c0_i32, %c0_i32_0, %c0_i32_1 : i32, i32, i32
  }
  func.func @transform_9(%arg0: i32) -> (i32, i32, i32) {
    %c0_i32 = arith.constant 0 : i32
    %c0_i32_0 = arith.constant 0 : i32
    %c0_i32_1 = arith.constant 0 : i32
    %c0_i32_2 = arith.constant 0 : i32
    return %c0_i32, %c0_i32_0, %c0_i32_1 : i32, i32, i32
  }
  func.func @transform_10(%arg0: i32) -> (i32, i32, i32) {
    %c0_i32 = arith.constant 0 : i32
    %c0_i32_0 = arith.constant 0 : i32
    %c0_i32_1 = arith.constant 0 : i32
    %c0_i32_2 = arith.constant 0 : i32
    return %c0_i32, %c0_i32_0, %c0_i32_1 : i32, i32, i32
  }
  func.func @transform_11(%arg0: i32) -> (i32, i32, i32) {
    %c0_i32 = arith.constant 0 : i32
    %c0_i32_0 = arith.constant 0 : i32
    %c0_i32_1 = arith.constant 0 : i32
    %c0_i32_2 = arith.constant 0 : i32
    return %c0_i32, %c0_i32_0, %c0_i32_1 : i32, i32, i32
  }
  func.func @transform_12(%arg0: i32) -> (i32, i32, i32) {
    %c0_i32 = arith.constant 0 : i32
    %c0_i32_0 = arith.constant 0 : i32
    %c0_i32_1 = arith.constant 0 : i32
    %c0_i32_2 = arith.constant 0 : i32
    return %c0_i32, %c0_i32_0, %c0_i32_1 : i32, i32, i32
  }
  func.func @transform_13(%arg0: i32) -> (i32, i32, i32) {
    %c0_i32 = arith.constant 0 : i32
    %c0_i32_0 = arith.constant 0 : i32
    %c0_i32_1 = arith.constant 0 : i32
    %c0_i32_2 = arith.constant 0 : i32
    return %c0_i32, %c0_i32_0, %c0_i32_1 : i32, i32, i32
  }
  func.func @transform_14(%arg0: i32) -> (i32, i32, i32) {
    %c0_i32 = arith.constant 0 : i32
    %c0_i32_0 = arith.constant 0 : i32
    %c0_i32_1 = arith.constant 0 : i32
    %c0_i32_2 = arith.constant 0 : i32
    return %c0_i32, %c0_i32_0, %c0_i32_1 : i32, i32, i32
  }
  func.func @transform_15(%arg0: i32) -> (i32, i32, i32) {
    %c0_i32 = arith.constant 0 : i32
    %c0_i32_0 = arith.constant 0 : i32
    %c0_i32_1 = arith.constant 0 : i32
    %c0_i32_2 = arith.constant 0 : i32
    return %c0_i32, %c0_i32_0, %c0_i32_1 : i32, i32, i32
  }
  func.func @transform_16(%arg0: i32) -> (i32, i32) {
    %c0_i32 = arith.constant 0 : i32
    %c0_i32_0 = arith.constant 0 : i32
    %c0_i32_1 = arith.constant 0 : i32
    return %c0_i32, %c0_i32_0 : i32, i32
  }
  func.func @transform_17(%arg0: i32) -> (i32, i32) {
    %c0_i32 = arith.constant 0 : i32
    %c0_i32_0 = arith.constant 0 : i32
    %c0_i32_1 = arith.constant 0 : i32
    return %c0_i32, %c0_i32_0 : i32, i32
  }
  func.func @transform_18(%arg0: i32) -> (i32, i32) {
    %c0_i32 = arith.constant 0 : i32
    %c0_i32_0 = arith.constant 0 : i32
    %c0_i32_1 = arith.constant 0 : i32
    return %c0_i32, %c0_i32_0 : i32, i32
  }
  func.func @transform_19(%arg0: i32) -> (i32, i32) {
    %c0_i32 = arith.constant 0 : i32
    %c0_i32_0 = arith.constant 0 : i32
    %c0_i32_1 = arith.constant 0 : i32
    return %c0_i32, %c0_i32_0 : i32, i32
  }
  func.func @transform_20(%arg0: i32) -> (i32, i32, i32) {
    %c0_i32 = arith.constant 0 : i32
    %c0_i32_0 = arith.constant 0 : i32
    %c0_i32_1 = arith.constant 0 : i32
    return %arg0, %c0_i32, %c0_i32_0 : i32, i32, i32
  }
}

</mosaic_0001>

<bundles_post_ra>
// kernel: _lambda_.1
= control target key start
LH: loop header
LB: loop body
LE: loop exit
PB: predicated region body
PF: predicated region fallthrough
CT: control target
= control target key end

     0   :  { %s2923_s0 = inlined_call_operand.vmem [shape: f32[16,32], index: 0, kind: input, shape index: {}]   ;;  %s2924_s1 = inlined_call_operand.vmem [shape: f32[2,1,8], index: 1, kind: input, shape index: {}]   ;;  %s2925_s2 = inlined_call_operand.vmem [shape: f32[1,32], index: 2, kind: input, shape index: {}]   ;;  %s2926_s3 = inlined_call_operand.vmem [shape: f32[1,32], index: 3, kind: input, shape index: {}]   ;;  %s2927_s4 = inlined_call_operand.vmem [shape: f32[2,32,96], index: 4, kind: input, shape index: {}]   ;;  %s2928_s5 = inlined_call_operand.vmem [shape: f32[2,1,96], index: 5, kind: input, shape index: {}]   ;;  %s2929_s6 = inlined_call_operand.vmem [shape: f32[2,32,32], index: 6, kind: input, shape index: {}]   ;;  %s2930_s7 = inlined_call_operand.vmem [shape: f32[2,1,32], index: 7, kind: input, shape index: {}, may-alias: {7,9,13,15}]   ;;  %s2931_s8 = inlined_call_operand.vmem [shape: f32[2,1,32], index: 8, kind: input, shape index: {}, may-alias: {8,14}]   ;;  %s2932_s9 = inlined_call_operand.vmem [shape: f32[2,1,32], index: 9, kind: input, shape index: {}, may-alias: {7,9,13,15}]   ;;  %s2933_s10 = inlined_call_operand.hbm [shape: f32[2,32,64], index: 10, kind: input, shape index: {}]   ;;  %s2934_s11 = inlined_call_operand.vmem [shape: f32[2,1,64], index: 11, kind: input, shape index: {}]   ;;  %s2935_s12 = inlined_call_operand.vmem [shape: f32[2,64,32], index: 12, kind: input, shape index: {}]   ;;  %s2936_s13 = inlined_call_operand.vmem [shape: f32[2,1,32], index: 13, kind: input, shape index: {}, may-alias: {7,9,13,15}]   ;;  %s2937_s14 = inlined_call_operand.vmem [shape: f32[2,1,32], index: 14, kind: input, shape index: {}, may-alias: {8,14}]   ;;  %s2938_s15 = inlined_call_operand.vmem [shape: f32[2,1,32], index: 15, kind: input, shape index: {}, may-alias: {7,9,13,15}]   ;;  %s2939_s16 = inlined_call_operand.vmem [shape: f32[32,128], index: 16, kind: input, shape index: {}]   ;;  %s2940_s17 = inlined_call_operand.vmem [shape: f32[1,128], index: 17, kind: input, shape index: {}, may-alias: {17,19}]   ;;  %s2941_s18 = inlined_call_operand.hbm [shape: f32[128,128], index: 18, kind: input, shape index: {}]   ;;  %s2942_s19 = inlined_call_operand.vmem [shape: f32[1,128], index: 19, kind: input, shape index: {}, may-alias: {17,19}]   ;;  %s2943_s20 = inlined_call_operand.hbm [shape: f32[2,1,128], index: 20, kind: output, shape index: {}]  }
   0x1   :  { %2961 = sst [smem:[#allocation17_spill]] %s2923_s0 }
   0x2   :  { %2962 = sst [smem:[#allocation18_spill]] %s2924_s1 }
   0x3   :  { %2963 = sst [smem:[#allocation19_spill]] %s2925_s2 }
   0x4   :  { %2964 = sst [smem:[#allocation20_spill]] %s2926_s3 }
   0x5   :  { %2965 = sst [smem:[#allocation21_spill]] %s2927_s4 }
   0x6   :  { %2966 = sst [smem:[#allocation22_spill]] %s2928_s5 }
   0x7   :  { %2967 = sst [smem:[#allocation23_spill]] %s2929_s6 }
   0x8   :  { %25 = vsyncpa [#allocation3], 0 }
   0x9   :  { %26 = vsyncpa [#allocation6], 0 }
   0xa   :  { %27 = vsyncpa [#allocation4], 0 }
   0xb   :  { %29 = vsyncpa [#allocation4 + $0x1], 0  ;;  %s2493_s1 = smov 0   ;;  %s2495_s22 = smov 0  }
   0xc   :  { %s2497_s23 = smov 0   ;;  %s2499_s24 = smov 0  }
   0xd LB: > { %2968 = sst [smem:[#allocation11_spill]] %s2358_s1  ;;  %s2514_s2 = sadd.s32 4294967295, %s2370_s24   ;;  %s2370_s24 = sphi %s2499_s24, %s2997_s24   ;;  %s2366_s23 = sphi %s2497_s23, %s2999_s23   ;;  %s2362_s22 = sphi %s2495_s22, %s3001_s22   ;;  %s2358_s1 = sphi %s2493_s1, %s3000_s1  }
   0xe   : > { %2969 = sst [smem:[#allocation12_spill]] %s2366_s23  ;;  %s2022_s25 = sadd.s32 4294967294, %s2370_s24  }
   0xf   : > { %2970 = sst [smem:[#allocation13_spill]] %s2370_s24  ;;  %s2518_s3 = sadd.s32 1, %s2370_s24  }
  0x10   : > { %2971 = sst [smem:[#allocation14_spill]] %s2518_s3  ;;  %s472_s26 = sadd.s32 1, %s2366_s23 }
  0x11   : > { %s469_s27 = ssub.s32 %s2370_s24, %s2518_s3  ;;  %p482_p0 = scmp.ne.s32.totalorder %s2366_s23, %s2362_s22 }
  0x12   : > { %p470_p1 = scmp.eq.s32.totalorder %s469_s27, 0  ;;  %p483_p2 = scmp.eq.s32.totalorder %s2514_s2, 1 }
  0x13   : > { %p488_p3 = scmp.ne.s32.totalorder %s2362_s22, %s2358_s1  ;;  %p489_p4 = scmp.eq.s32.totalorder %s2022_s25, 1 }
  0x14   : > { %s2529_s28 = scalar_select %p470_p1, %s2366_s23, %s472_s26  }
  0x15   : > { %p2531_p5 = por %p483_p2, %p482_p0  ;;  %p2535_p6 = por %p489_p4, %p488_p3 }
  0x16   : > { %2972 = sst [smem:[#allocation15_spill]] %s2529_s28  ;;  %p2023_p7 = scmp.ge.s32.totalorder %s2370_s24, 1 }
  0x17   : > { %s2974_s29 = scalar_select %p2535_p6, 1, 0 }
  0x18   : > { %p496_p8 = scmp.lt.s32.totalorder %s2370_s24, 3  ;;  %p2117_p9 = scmp.eq.s32.totalorder %s2514_s2, 0 }
  0x19   : > { %2975 = sst [smem:[#allocation16_spill]] %s2974_s29  ;;  %s531_s25 = sshll.u32 %s2933_s10, 4  ;;  %s532_s25 = int_to_ptr.hbm [resolvable:$true] %s531_s25 }
  0x1a   : > { %p2542_p10 = pnand %p2023_p7, %p496_p8  ;;  %s2372_s26 = smov [#allocation2]  }
  0x1b   : > { %s533_s27 = sshll.u32 %s2372_s26, 4  ;;  %s566_s3 = sshll.u32 %s2941_s18, 4  ;;  %s534_s27 = int_to_ptr.vmem [resolvable:$true] %s533_s27  ;;  %s567_s3 = int_to_ptr.hbm [resolvable:$true] %s566_s3 }
  0x1c   : > { %p2106_p11 = pneg %p2542_p10  ;;  %s2373_s29 = smov 128  }
  0x1d   : > { %s2374_s1 = smov 8   ;;  %s2375_s24 = smov [#allocation5]  }
  0x1e   : > { %p2107_p12 = pnand %p2117_p9, %p2106_p11  ;;  %s568_s0 = sshll.u32 %s2375_s24, 4  ;;  %s569_s0 = int_to_ptr.vmem [resolvable:$true] %s568_s0 }
  0x1f   : > { %600 = sbr.rel (%p2542_p10) target bundleno = 4768 (0x12a0), region = 100 }
  0x20   : > { %2109 = dma.hbm_to_vmem [thread:$0]  (!%p2107_p12), %s532_s25, 1024, %s534_s27, [#allocation3], %s2373_s29, %s2373_s29, %s2374_s1  }
  0x21   : > { %2112 = dma.hbm_to_vmem [thread:$0]  (!%p2107_p12), %s567_s3, 2048, %s569_s0, [#allocation6], %s2373_s29, %s2373_s29, %s2374_s1  }
  0x24   : > { %2345 = dma.done.wait (%p2117_p9), [#allocation3], 1024  }
  0x25   : > { %2347 = vsyncadd (%p2117_p9), [#allocation3], 4294966272 }
  0x26   : > { %2349 = dma.done.wait (%p2117_p9), [#allocation6], 2048  }
  0x27   : > { %2351 = vsyncadd (%p2117_p9), [#allocation6], 4294965248  ;;  %p665_p13 = scmp.lt.s32.totalorder %s2514_s2, 1  ;;  %s2977_s28 = sld [smem:[#allocation17_spill]]  ;;  %vm675_vm0 = vcmask 261120   ;;  %v2376_v4 = vmov 32.0  }
  0x28   : > { %2188 = vrcp.f32 %v2376_v4  ;;  %s2978_s25 = sld [smem:[#allocation21_spill]]  ;;  %s2959_s24 = smov 120   ;;  %vm756_vm5 = vcmask 64512   ;;  %vm1210_vm9 = vcmask 523264  }
  0x29   : > { %s2568_s23 = scalar_select %p665_p13, %s2514_s2, 1 }
  0x2a   : > { %s2979_s30 = sld [smem:[#allocation19_spill]]  ;;  %s2960_s3 = smov 96  }
  0x2b   : > { %s2030_s1 = sshll.u32 %s2568_s23, 3  ;;  %s2980_s27 = sld [smem:[#allocation20_spill]] }
  0x2c   : > { %s2981_s5 = sld [smem:[#allocation22_spill]]  ;;  %s2958_s0 = smov 72  }
  0x2d   : > { %s668_s29 = scalar_lea.vmem %s2977_s28, %s2030_s1  ;;  %s2951_s28 = smov 88  }
  0x2e   : > { %v672_v0 = vld [vmem:[%s668_s29] sm:$0xff]  ;;  %v2189_v5 = vpop.eup %2188  ;;  %v721_v10 = vld [vmem:[%s2978_s25 + $0x18] sm:$0xff]  ;;  %v720_v11 = vld [vmem:[%s2978_s25 + $0x10] sm:$0xff]  ;;  %s2380_s29 = smov 64   ;;  %s2982_s26 = sld [smem:[#allocation18_spill]] }
  0x2f   : > { %v676_v1 = vsel %vm675_vm0, %v672_v0, 0.0  ;;  %v687_v2 = vmul.f32 %v672_v0, %v672_v0  ;;  %v680_v6 = vmul.f32 32.0, %v2189_v5  ;;  %vm684_vm1 = vweird.f32 %v2189_v5  ;;  %741 = vmatpush.msra.mxu0 %v721_v10  ;;  %v719_v13 = vld [vmem:[%s2978_s25 + $0x8] sm:$0xff]  ;;  %v718_v15 = vld [vmem:[%s2978_s25] sm:$0xff]  ;;  %s2983_s6 = sld [smem:[#allocation23_spill]]  ;;  %s2956_s21 = smov 112  }
  0x30   : > { %677 = vadd.xlane.f32.xlu0 %v676_v1  ;;  %v2170_v29 = vld [vmem:[%s2979_s30] ss:$0 sm:$0xff]  ;;  %s2957_s30 = smov 80   ;;  %s2952_s1 = smov 48  }
  0x31   : > { %v688_v3 = vsel %vm675_vm0, %v687_v2, 0.0  ;;  %v681_v7 = vsub.f32 1.0, %v680_v6  ;;  %742 = vmatpush.msra.mxu0 %v720_v11  ;;  %v2171_v32 = vld [vmem:[%s2980_s27] ss:$0 sm:$0xff] }
  0x32   : > { %v2172_v35 = vld [vmem:[%s2981_s5] ss:$0 sm:$0xff] }
  0x33   : > { %v682_v8 = vmul.f32 %v2189_v5, %v681_v7  ;;  %743 = vmatpush.msra.mxu0 %v719_v13 }
  0x34   : > { %s671_s27 = scalar_lea.vmem %s2982_s26, %s2568_s23  ;;  %s2954_s23 = smov 56  }
  0x35   : > { %v683_v9 = vadd.f32 %v2189_v5, %v682_v8  ;;  %744 = vmatpush.msra.mxu0 %v718_v15  ;;  %v715_v42 = vld [vmem:[%s671_s27] sm:$0x1]  ;;  %v750_v13 = vld [vmem:[%s2983_s6 + $0x8] sm:$0xff]  ;;  %s2953_s26 = smov 40   ;;  %s2990_s27 = smov 104  }
  0x36   : > { %v716_v43 = vsub.f32 1.0, %v715_v42  ;;  %v749_v50 = vld [vmem:[%s2983_s6] sm:$0xff] }
  0x37   : > { %v2585_v14 = vsel %vm684_vm1, %v2189_v5, %v683_v9 }
  0x38   : > { %689 = vadd.xlane.f32.xlu0 %v688_v3  ;;  %v717_v44 = vmul.f32 -1e+09, %v716_v43 }
  0x3a   : > { %v2624_v45 = vperm.slane %v717_v44, 0 }
  0xa3   : > { %v678_v12 = vpop.xlane.xlu0 %677 }
  0xa4   : > { %v686_v16 = vmul.f32 %v2585_v14, %v678_v12 }
  0xa6   : > { %v692_v18 = vmul.f32 %v686_v16, %v686_v16  ;;  %v694_v28 = vsub.f32 %v672_v0, %v686_v16 }
  0xab   : > { %v690_v17 = vpop.xlane.xlu0 %689 }
  0xac   : > { %v691_v19 = vmul.f32 %v690_v17, %v2585_v14 }
  0xae   : > { %v693_v20 = vsub.f32 %v691_v19, %v692_v18 }
  0xb0   : > { %v695_v21 = vadd.f32 1e-05, %v693_v20 }
  0xb2   : > { %2190 = vrsqrt.f32 %v695_v21  ;;  %vm702_vm3 = vweird.f32 %v695_v21 }
  0xb8   : > { %v2191_v22 = vpop.eup %2190 }
  0xb9   : > { %v697_v23 = vmul.f32 %v2191_v22, %v695_v21  ;;  %vm703_vm2 = vweird.f32 %v2191_v22 }
  0xba   : > { %vm704_vm4 = vmor %vm702_vm3, %vm703_vm2 }
  0xbb   : > { %v698_v24 = vmul.f32 %v2191_v22, %v697_v23 }
  0xbd   : > { %v699_v25 = vmul.f32 0.5, %v698_v24 }
  0xbf   : > { %v700_v26 = vsub.f32 1.5, %v699_v25 }
  0xc1   : > { %v701_v27 = vmul.f32 %v2191_v22, %v700_v26 }
  0xc3   : > { %v705_v30 = vsel %vm704_vm4, %v2191_v22, %v701_v27  ;;  %vm1897_vm4 = vcmask 1040384  }
  0xc4   : > { %v706_v31 = vmul.f32 %v705_v30, %v694_v28 }
  0xc6   : > { %v710_v33 = vmul.f32 %v2170_v29, %v706_v31 }
  0xc8   : > { %v2598_v34 = vadd.f32 %v2171_v32, %v710_v33 }
  0xca   : > { %2031 = vmatmul.msk.f32.vlgmr.msra.gmra.mxu0 %vm675_vm0, %v2598_v34 }
 0x147   : > { %v746_v36 = vpop.f32.mrf.mxu0 }
 0x148   : > { %v2605_v37 = vadd.f32 %v2172_v35, %v746_v36 }
 0x14a   : > { %823 = vrot.lane.b32.xlu2 %v2605_v37, %s2959_s24  ;;  %754 = vrot.lane.b32.xlu1 %v2605_v37, %s2960_s3  ;;  %s2987_s24 = smov 80  }
 0x152   : > { %825 = vrot.lane.b32.xlu1 %v2605_v37, %s2951_s28  ;;  %s2955_s28 = smov 104  }
 0x15a   : > { %797 = vrot.lane.b32.xlu1 %v2605_v37, %s2380_s29 }
 0x1a4   : > { %v824_v40 = vpop.permute.xlu2 %823 }
 0x1bc   : > { %v755_v38 = vpop.permute.xlu1 %754 }
 0x1bd   : > { %2032 = vmatpush.xpose.msk.msra.mxu1 %vm756_vm5, %v755_v38 }
 0x1c0   : > { %2033 = vmatmul.msk.f32.vlgmr.msra.gmra.mxu1 %vm756_vm5, %v2605_v37 }
 0x1c4   : > { %v826_v39 = vpop.permute.xlu1 %825 }
 0x1c5   : > { %2035 = vmatpush.xpose.msk.msra.mxu3 %vm756_vm5, %v826_v39 }
 0x1c8   : > { %2036 = vmatmul.msk.f32.vlgmr.msra.gmra.mxu3 %vm756_vm5, %v824_v40 }
 0x1c9   : > { %931 = vmatpush.msrb.mxu3 %v749_v50 }
 0x1cc   : > { %v798_v41 = vpop.permute.xlu1 %797 }
 0x1cd   : > { %818 = vmatpush.msrb.mxu1 %v798_v41 }
 0x1cf   : > { %908 = vmatpush.msra.mxu1 %v750_v13 }
 0x23d   : > { %v778_v46 = vpop.f32.mrf.mxu1 }
 0x23e   : > { %v781_v47 = vmul.f32 0.35355338, %v778_v46  ;;  %v752_v46 = vld [vmem:[%s2983_s6 + $0x18] sm:$0xff] }
 0x240   : > { %v785_v48 = vadd.f32 %v2624_v45, %v781_v47 }
 0x242   : > { %v786_v49 = vsel %vm756_vm5, %v785_v48, -inf }
 0x243   : > { %787 = vmax.xlane.f32.xlu2 %v786_v49 }
 0x24b   : > { %v848_v55 = vpop.f32.mrf.mxu3 }
 0x24c   : > { %v851_v57 = vmul.f32 0.35355338, %v848_v55 }
 0x24e   : > { %v852_v59 = vadd.f32 %v851_v57, %v2624_v45 }
 0x250   : > { %v853_v60 = vsel %vm756_vm5, %v852_v59, -inf }
 0x25b   : > { %1029 = vrot.lane.b32.xlu2 %v2605_v37, %s2958_s0  ;;  %s2991_s0 = smov 56  }
 0x2b6   : > { %v788_v51 = vpop.xlane.xlu2 %787 }
 0x2b7   : > { %v789_v52 = vsub.f32 %v785_v48, %v788_v51 }
 0x2b9   : > { %v790_v53 = vmul.f32 1.442695, %v789_v52 }
 0x2bb   : > { %2192 = vpow2.f32 %v790_v53  ;;  %v2173_v53 = vld [vmem:[%s2930_s7] ss:$0 sm:$0xff] }
 0x2be   : > { %v1030_v54 = vpop.permute.xlu2 %1029 }
 0x2bf   : > { %2044 = vmatpush.xpose.msk.msra.mxu3 %vm756_vm5, %v1030_v54 }
 0x2c1   : > { %v2193_v56 = vpop.eup %2192 }
 0x2c2   : > { %v792_v58 = vsel %vm756_vm5, %v2193_v56, 0.0 }
 0x2c3   : > { %793 = vadd.xlane.f32.xlu0 %v792_v58 }
 0x2cb   : > { %854 = vmax.xlane.f32.xlu0 %v853_v60 }
 0x2df   : > { %864 = vrot.lane.b32.xlu0 %v2605_v37, %s2954_s23  ;;  %s2984_s23 = smov 96  }
 0x2e7   : > { %1027 = vrot.lane.b32.xlu0 %v2605_v37, %s2955_s28  ;;  %s2985_s28 = smov 120  }
 0x2ef   : > { %938 = vrot.lane.b32.xlu0 %v2605_v37, %s2957_s30  ;;  %s2992_s30 = smov 40  }
 0x336   : > { %v794_v61 = vpop.xlane.xlu0 %793 }
 0x337   : > { %2194 = vrcp.f32 %v794_v61  ;;  %v1161_v61 = vld [vmem:[#allocation2 + $0x18] sm:$0xff] }
 0x33d   : > { %v2195_v62 = vpop.eup %2194 }
 0x33e   : > { %v855_v63 = vpop.xlane.xlu0 %854  ;;  %v796_v0 = vmul.f32 %v2195_v62, %v2193_v56  ;;  %v1160_v62 = vld [vmem:[#allocation2 + $0x10] sm:$0xff] }
 0x33f   : > { %v856_v1 = vsub.f32 %v852_v59, %v855_v63  ;;  %v1159_v63 = vld [vmem:[#allocation2 + $0x8] sm:$0xff] }
 0x340   : > { %2034 = vmatmul.msk.f32.vlgmr.msrb.gmra.mxu1 %vm756_vm5, %v796_v0  ;;  %v1158_v0 = vld [vmem:[#allocation2] sm:$0xff] }
 0x341   : > { %v857_v2 = vmul.f32 1.442695, %v856_v1 }
 0x343   : > { %2196 = vpow2.f32 %v857_v2 }
 0x349   : > { %v2197_v3 = vpop.eup %2196 }
 0x34a   : > { %v859_v4 = vsel %vm756_vm5, %v2197_v3, 0.0 }
 0x34b   : > { %860 = vadd.xlane.f32.xlu1 %v859_v4 }
 0x351   : > { %v865_v5 = vpop.permute.xlu0 %864 }
 0x352   : > { %885 = vmatpush.msrb.mxu0 %v865_v5 }
 0x359   : > { %v1028_v6 = vpop.permute.xlu0 %1027 }
 0x361   : > { %v939_v7 = vpop.permute.xlu0 %938 }
 0x362   : > { %2040 = vmatpush.xpose.msk.msra.mxu0 %vm756_vm5, %v939_v7 }
 0x364   : > { %936 = vrot.lane.b32.xlu1 %v2605_v37, %s2956_s21  ;;  %s2986_s21 = smov 72  }
 0x3bd   : > { %v820_v8 = vpop.f32.mrf.mxu1 }
 0x3be   : > { %2039 = vmatmul.msk.f32.vlgmr.msrb.gmra.mxu3 %vm756_vm5, %v820_v8  ;;  %v861_v9 = vpop.xlane.xlu1 %860 }
 0x3bf   : > { %2198 = vrcp.f32 %v861_v9 }
 0x3c5   : > { %v2199_v10 = vpop.eup %2198 }
 0x3c6   : > { %2045 = vmatmul.msk.f32.vlgmr.msra.gmra.mxu3 %vm756_vm5, %v1028_v6  ;;  %v863_v11 = vmul.f32 %v2199_v10, %v2197_v3 }
 0x3c8   : > { %2037 = vmatmul.msk.f32.vlgmr.msrb.gmra.mxu0 %vm756_vm5, %v863_v11 }
 0x3d6   : > { %v937_v12 = vpop.permute.xlu1 %936 }
 0x3d7   : > { %2041 = vmatmul.msk.f32.vlgmr.msra.gmra.mxu0 %vm756_vm5, %v937_v12 }
 0x441   : > { %v933_v15 = vpop.f32.mrf.mxu3 }
 0x445   : > { %v887_v16 = vpop.f32.mrf.mxu0 }
 0x446   : > { %2038 = vmatmul.msk.f32.vlgmr.msra.gmra.mxu1 %vm756_vm5, %v887_v16 }
 0x449   : > { %v1052_v17 = vpop.f32.mrf.mxu3 }
 0x44a   : > { %v1055_v18 = vmul.f32 0.35355338, %v1052_v17 }
 0x44c   : > { %v1056_v19 = vadd.f32 %v1055_v18, %v2624_v45  ;;  %v2175_v18 = vld [vmem:[%s2932_s9] ss:$0 sm:$0xff] }
 0x44e   : > { %v1057_v20 = vsel %vm756_vm5, %v1056_v19, -inf }
 0x44f   : > { %1058 = vmax.xlane.f32.xlu2 %v1057_v20 }
 0x454   : > { %v961_v21 = vpop.f32.mrf.mxu0 }
 0x455   : > { %v964_v22 = vmul.f32 0.35355338, %v961_v21  ;;  %v1205_v21 = vld [vmem:[%s2935_s12 + $0x38] sm:$0xff] }
 0x456   : > { %1222 = vmatpush.msrb.mxu3 %v1205_v21 }
 0x457   : > { %v965_v23 = vadd.f32 %v964_v22, %v2624_v45  ;;  %v1204_v22 = vld [vmem:[%s2935_s12 + $0x30] sm:$0xff] }
 0x458   : > { %1223 = vmatpush.msrb.mxu3 %v1204_v22 }
 0x459   : > { %v966_v24 = vsel %vm756_vm5, %v965_v23, -inf }
 0x45a   : > { %967 = vmax.xlane.f32.xlu0 %v966_v24  ;;  %v1202_v24 = vld [vmem:[%s2935_s12 + $0x20] sm:$0xff] }
 0x467   : > { %977 = vrot.lane.b32.xlu2 %v2605_v37, %s2952_s1  ;;  %s663_s1 = sand.u32 1, %s2362_s22  }
 0x4c2   : > { %v1059_v25 = vpop.xlane.xlu2 %1058 }
 0x4c3   : > { %v1060_v26 = vsub.f32 %v1056_v19, %v1059_v25  ;;  %v910_v49 = vpop.f32.mrf.mxu1  ;;  %v1201_v25 = vld [vmem:[%s2935_s12 + $0x18] sm:$0xff] }
 0x4c4   : > { %v934_v50 = vadd.f32 %v933_v15, %v910_v49  ;;  %v2174_v15 = vld [vmem:[%s2931_s8] ss:$0 sm:$0xff] }
 0x4c5   : > { %v1061_v27 = vmul.f32 1.442695, %v1060_v26  ;;  %v1200_v26 = vld [vmem:[%s2935_s12 + $0x10] sm:$0xff] }
 0x4c7   : > { %2200 = vpow2.f32 %v1061_v27  ;;  %v1199_v27 = vld [vmem:[%s2935_s12 + $0x8] sm:$0xff] }
 0x4ca   : > { %v978_v28 = vpop.permute.xlu2 %977 }
 0x4cb   : > { %998 = vmatpush.msra.mxu2 %v978_v28  ;;  %v1198_v28 = vld [vmem:[%s2935_s12] sm:$0xff] }
 0x4cd   : > { %v2201_v29 = vpop.eup %2200  ;;  %v968_v30 = vpop.xlane.xlu0 %967  ;;  %1112 = vmatpush.msrb.mxu2 %v752_v46 }
 0x4ce   : > { %v969_v31 = vsub.f32 %v965_v23, %v968_v30  ;;  %v1063_v32 = vsel %vm756_vm5, %v2201_v29, 0.0  ;;  %v1203_v23 = vld [vmem:[%s2935_s12 + $0x28] sm:$0xff] }
 0x4cf   : > { %1064 = vadd.xlane.f32.xlu0 %v1063_v32  ;;  %1224 = vmatpush.msrb.mxu3 %v1203_v23 }
 0x4d0   : > { %v970_v33 = vmul.f32 1.442695, %v969_v31 }
 0x4d1   : > { %1225 = vmatpush.msrb.mxu3 %v1202_v24 }
 0x4d2   : > { %2202 = vpow2.f32 %v970_v33 }
 0x4d3   : > { %1226 = vmatpush.msrb.mxu3 %v1201_v25 }
 0x4d5   : > { %1227 = vmatpush.msrb.mxu3 %v1200_v26 }
 0x4d7   : > { %1228 = vmatpush.msrb.mxu3 %v1199_v27 }
 0x4d8   : > { %v2203_v35 = vpop.eup %2202 }
 0x4d9   : > { %v972_v36 = vsel %vm756_vm5, %v2203_v35, 0.0  ;;  %1229 = vmatpush.msrb.mxu3 %v1198_v28 }
 0x4da   : > { %973 = vadd.xlane.f32.xlu1 %v972_v36 }
 0x4e3   : > { %1068 = vrot.lane.b32.xlu0 %v2605_v37, %s2953_s26  ;;  %v751_v37 = vld [vmem:[%s2983_s6 + $0x10] sm:$0xff]  ;;  %s2989_s26 = smov 88  }
 0x4e4   : > { %1021 = vmatpush.msrb.mxu1 %v751_v37 }
 0x4e6   : > { %1181 = vmatpush.msra.mxu1 %v1161_v61 }
 0x4e8   : > { %1182 = vmatpush.msra.mxu1 %v1160_v62 }
 0x4ea   : > { %1183 = vmatpush.msra.mxu1 %v1159_v63 }
 0x4ec   : > { %1184 = vmatpush.msra.mxu1 %v1158_v0 }
 0x542   : > { %v1065_v38 = vpop.xlane.xlu0 %1064 }
 0x543   : > { %2204 = vrcp.f32 %v1065_v38 }
 0x549   : > { %v2205_v40 = vpop.eup %2204 }
 0x54a   : > { %v1067_v42 = vmul.f32 %v2205_v40, %v2201_v29  ;;  %v2176_v29 = vld [vmem:[%s2934_s11] ss:$0 sm:$0xff] }
 0x54d   : > { %v974_v39 = vpop.xlane.xlu1 %973 }
 0x54e   : > { %2206 = vrcp.f32 %v974_v39 }
 0x554   : > { %v2207_v41 = vpop.eup %2206 }
 0x555   : > { %v1069_v43 = vpop.permute.xlu0 %1068  ;;  %v976_v44 = vmul.f32 %v2207_v41, %v2203_v35 }
 0x556   : > { %1089 = vmatpush.msrb.mxu0 %v1069_v43  ;;  %v2177_v43 = vld [vmem:[%s2936_s13] ss:$0 sm:$0xff] }
 0x557   : > { %2042 = vmatmul.msk.f32.vlgmr.msra.gmra.mxu2 %vm756_vm5, %v976_v44  ;;  %2046 = vmatmul.msk.f32.vlgmr.msrb.gmra.mxu0 %vm756_vm5, %v1067_v42 }
 0x5d4   : > { %v1091_v47 = vpop.f32.mrf.mxu0 }
 0x5d5   : > { %2047 = vmatmul.msk.f32.vlgmr.msrb.gmra.mxu2 %vm756_vm5, %v1091_v47 }
 0x5da   : > { %v1000_v48 = vpop.f32.mrf.mxu2 }
 0x5db   : > { %2043 = vmatmul.msk.f32.vlgmr.msrb.gmra.mxu1 %vm756_vm5, %v1000_v48 }
 0x658   : > { %v1023_v51 = vpop.f32.mrf.mxu1  ;;  %v1114_v54 = vpop.f32.mrf.mxu2 }
 0x659   : > { %v1026_v52 = vadd.f32 %v1023_v51, %v934_v50  ;;  %v2053_v50 = vld [vmem:[%s2978_s25 + $0x38] sm:$0xff]  ;;  %v2052_v51 = vld [vmem:[%s2978_s25 + $0x30] sm:$0xff] }
 0x65a   : > { %1294 = vmatpush.msra.mxu0 %v2053_v50 }
 0x65b   : > { %v1117_v55 = vadd.f32 %v1114_v54, %v1026_v52  ;;  %v2051_v52 = vld [vmem:[%s2978_s25 + $0x28] sm:$0xff] }
 0x65c   : > { %1295 = vmatpush.msra.mxu0 %v2052_v51 }
 0x65d   : > { %v1122_v56 = vadd.f32 %v2173_v53, %v1117_v55  ;;  %v2050_v53 = vld [vmem:[%s2978_s25 + $0x20] sm:$0xff] }
 0x65e   : > { %1296 = vmatpush.msra.mxu0 %v2051_v52 }
 0x65f   : > { %v1123_v57 = vadd.f32 %v1122_v56, %v2598_v34 }
 0x660   : > { %1297 = vmatpush.msra.mxu0 %v2050_v53 }
 0x661   : > { %v1126_v58 = vsel %vm675_vm0, %v1123_v57, 0.0  ;;  %v1130_v59 = vmul.f32 %v1123_v57, %v1123_v57 }
 0x662   : > { %1127 = vadd.xlane.f32.xlu1 %v1126_v58 }
 0x663   : > { %v1131_v60 = vsel %vm675_vm0, %v1130_v59, 0.0 }
 0x664   : > { %1132 = vadd.xlane.f32.xlu0 %v1131_v60 }
 0x6d5   : > { %v1128_v1 = vpop.xlane.xlu1 %1127 }
 0x6d6   : > { %v1129_v2 = vmul.f32 %v1128_v1, %v2585_v14 }
 0x6d7   : > { %v1133_v3 = vpop.xlane.xlu0 %1132 }
 0x6d8   : > { %v1135_v34 = vmul.f32 %v1129_v2, %v1129_v2  ;;  %v1134_v4 = vmul.f32 %v1133_v3, %v2585_v14  ;;  %v1137_v13 = vsub.f32 %v1123_v57, %v1129_v2 }
 0x6da   : > { %v1136_v5 = vsub.f32 %v1134_v4, %v1135_v34  ;;  %v2178_v34 = vld [vmem:[%s2937_s14] ss:$0 sm:$0xff] }
 0x6dc   : > { %v1138_v6 = vadd.f32 1e-05, %v1136_v5 }
 0x6de   : > { %2208 = vrsqrt.f32 %v1138_v6  ;;  %vm1145_vm7 = vweird.f32 %v1138_v6 }
 0x6e4   : > { %v2209_v7 = vpop.eup %2208 }
 0x6e5   : > { %v1140_v8 = vmul.f32 %v2209_v7, %v1138_v6  ;;  %vm1146_vm6 = vweird.f32 %v2209_v7  ;;  %v2179_v6 = vld [vmem:[%s2938_s15] ss:$0 sm:$0xff] }
 0x6e6   : > { %vm1147_vm8 = vmor %vm1145_vm7, %vm1146_vm6 }
 0x6e7   : > { %v1141_v9 = vmul.f32 %v2209_v7, %v1140_v8 }
 0x6e9   : > { %v1142_v10 = vmul.f32 0.5, %v1141_v9  ;;  %v2180_v9 = vld [vmem:[%s2981_s5 + $0x1] ss:$0 sm:$0xff] }
 0x6eb   : > { %v1143_v11 = vsub.f32 1.5, %v1142_v10 }
 0x6ed   : > { %v1144_v12 = vmul.f32 %v2209_v7, %v1143_v11 }
 0x6ef   : > { %v1148_v16 = vsel %vm1147_vm8, %v2209_v7, %v1144_v12  ;;  %v2056_v12 = vld [vmem:[%s2983_s6 + $0x20] sm:$0xff] }
 0x6f0   : > { %v1149_v17 = vmul.f32 %v1148_v16, %v1137_v13  ;;  %1481 = vmatpush.msra.mxu3 %v2056_v12 }
 0x6f2   : > { %v1153_v19 = vmul.f32 %v2174_v15, %v1149_v17 }
 0x6f4   : > { %v1157_v20 = vadd.f32 %v2175_v18, %v1153_v19 }
 0x6f6   : > { %2048 = vmatmul.msk.f32.vlgmr.msra.gmra.mxu1 %vm675_vm0, %v1157_v20 }
 0x773   : > { %v1186_v30 = vpop.f32.mrf.mxu1 }
 0x774   : > { %v1187_v31 = vadd.f32 %v2176_v29, %v1186_v30 }
 0x776   : > { %v1190_v32 = vmul.f32 0.044715, %v1187_v31  ;;  %v1189_v40 = vmul.f32 0.5, %v1187_v31 }
 0x778   : > { %v1191_v33 = vmul.f32 %v1190_v32, %v1187_v31 }
 0x77a   : > { %v1192_v35 = vmul.f32 %v1191_v33, %v1187_v31 }
 0x77c   : > { %v1193_v36 = vadd.f32 %v1192_v35, %v1187_v31 }
 0x77e   : > { %v1194_v38 = vmul.f32 0.7978846, %v1193_v36 }
 0x780   : > { %2210 = vtanh.f32 %v1194_v38 }
 0x786   : > { %v2211_v39 = vpop.eup %2210 }
 0x787   : > { %v1196_v41 = vadd.f32 1.0, %v2211_v39 }
 0x789   : > { %v1197_v42 = vmul.f32 %v1196_v41, %v1189_v40 }
 0x78b   : > { %2049 = vmatmul.msk.f32.vlgmr.msrb.gmra.mxu3 %vm1210_vm9, %v1197_v42 }
 0x80e   : > { %v1231_v44 = vpop.f32.mrf.mxu3 }
 0x80f   : > { %v1232_v46 = vadd.f32 %v2177_v43, %v1231_v44 }
 0x811   : > { %v1234_v37 = vadd.f32 %v1232_v46, %v1157_v20 }
 0x813   : > { %v1237_v47 = vsel %vm675_vm0, %v1234_v37, 0.0  ;;  %v1241_v48 = vmul.f32 %v1234_v37, %v1234_v37 }
 0x814   : > { %1238 = vadd.xlane.f32.xlu2 %v1237_v47 }
 0x815   : > { %v1242_v49 = vsel %vm675_vm0, %v1241_v48, 0.0 }
 0x816   : > { %1243 = vadd.xlane.f32.xlu1 %v1242_v49 }
 0x887   : > { %v1239_v54 = vpop.xlane.xlu2 %1238 }
 0x888   : > { %v1240_v55 = vmul.f32 %v1239_v54, %v2585_v14 }
 0x889   : > { %v1244_v56 = vpop.xlane.xlu1 %1243 }
 0x88a   : > { %v1246_v57 = vmul.f32 %v1240_v55, %v1240_v55  ;;  %v1245_v58 = vmul.f32 %v1244_v56, %v2585_v14  ;;  %v1248_v3 = vsub.f32 %v1234_v37, %v1240_v55 }
 0x88c   : > { %v1247_v59 = vsub.f32 %v1245_v58, %v1246_v57 }
 0x88e   : > { %v1249_v60 = vadd.f32 1e-05, %v1247_v59 }
 0x890   : > { %2212 = vrsqrt.f32 %v1249_v60  ;;  %vm1256_vm11 = vweird.f32 %v1249_v60 }
 0x896   : > { %v2213_v61 = vpop.eup %2212 }
 0x897   : > { %v1251_v62 = vmul.f32 %v2213_v61, %v1249_v60  ;;  %vm1257_vm10 = vweird.f32 %v2213_v61 }
 0x898   : > { %vm1258_vm12 = vmor %vm1256_vm11, %vm1257_vm10 }
 0x899   : > { %v1252_v63 = vmul.f32 %v2213_v61, %v1251_v62 }
 0x89b   : > { %v1253_v0 = vmul.f32 0.5, %v1252_v63 }
 0x89d   : > { %v1254_v1 = vsub.f32 1.5, %v1253_v0 }
 0x89f   : > { %v1255_v2 = vmul.f32 %v2213_v61, %v1254_v1 }
 0x8a1   : > { %v1259_v4 = vsel %vm1258_vm12, %v2213_v61, %v1255_v2 }
 0x8a2   : > { %v1260_v5 = vmul.f32 %v1259_v4, %v1248_v3  ;;  %v2057_v4 = vld [vmem:[%s2983_s6 + $0x28] sm:$0xff] }
 0x8a4   : > { %v1264_v7 = vmul.f32 %v2178_v34, %v1260_v5 }
 0x8a6   : > { %v2744_v8 = vadd.f32 %v2179_v6, %v1264_v7 }
 0x8a8   : > { %2055 = vmatmul.msk.f32.vlgmr.msra.gmra.mxu0 %vm675_vm0, %v2744_v8 }
 0x925   : > { %v1299_v10 = vpop.f32.mrf.mxu0 }
 0x926   : > { %v2751_v11 = vadd.f32 %v2180_v9, %v1299_v10 }
 0x928   : > { %1347 = vrot.lane.b32.xlu0 %v2751_v11, %s2380_s29  ;;  %1308 = vrot.lane.b32.xlu1 %v2751_v11, %s2984_s23  ;;  %s2988_s29 = smov 112   ;;  %s2993_s23 = smov 48  }
 0x930   : > { %1373 = vrot.lane.b32.xlu0 %v2751_v11, %s2985_s28  ;;  %s1924_s28 = scalar_lea.sflag [#allocation4], %s663_s1 }
 0x938   : > { %1579 = vrot.lane.b32.xlu0 %v2751_v11, %s2986_s21 }
 0x940   : > { %1488 = vrot.lane.b32.xlu0 %v2751_v11, %s2987_s24 }
 0x99a   : > { %v1348_v13 = vpop.permute.xlu0 %1347  ;;  %v1309_v15 = vpop.permute.xlu1 %1308 }
 0x99b   : > { %2060 = vmatpush.xpose.msk.msra.mxu2 %vm756_vm5, %v1309_v15  ;;  %1368 = vmatpush.msrb.mxu1 %v1348_v13 }
 0x99d   : > { %1458 = vmatpush.msra.mxu1 %v2057_v4 }
 0x99e   : > { %2061 = vmatmul.msk.f32.vlgmr.msra.gmra.mxu2 %vm756_vm5, %v2751_v11 }
 0x9a2   : > { %v1374_v16 = vpop.permute.xlu0 %1373 }
 0x9aa   : > { %v1580_v17 = vpop.permute.xlu0 %1579 }
 0x9ab   : > { %2072 = vmatpush.xpose.msk.msrb.mxu3 %vm756_vm5, %v1580_v17 }
 0x9b2   : > { %v1489_v31 = vpop.permute.xlu0 %1488 }
 0xa21   : > { %v1331_v18 = vpop.f32.mrf.mxu2 }
 0xa22   : > { %v1334_v19 = vmul.f32 0.35355338, %v1331_v18 }
 0xa24   : > { %v1335_v20 = vadd.f32 %v1334_v19, %v2624_v45 }
 0xa26   : > { %v1336_v21 = vsel %vm756_vm5, %v1335_v20, -inf }
 0xa27   : > { %1337 = vmax.xlane.f32.xlu1 %v1336_v21 }
 0xa40   : > { %1486 = vrot.lane.b32.xlu1 %v2751_v11, %s2988_s29  ;;  %s2320_s29 = scalar_lea.hbm %s2943_s20, 2 }
 0xa9a   : > { %v1338_v22 = vpop.xlane.xlu1 %1337 }
 0xa9b   : > { %v1339_v23 = vsub.f32 %v1335_v20, %v1338_v22 }
 0xa9d   : > { %v1340_v24 = vmul.f32 1.442695, %v1339_v23  ;;  %v2181_v23 = vld [vmem:[%s2930_s7 + $0x1] ss:$0 sm:$0xff] }
 0xa9f   : > { %2214 = vpow2.f32 %v1340_v24 }
 0xaa5   : > { %v2215_v25 = vpop.eup %2214 }
 0xaa6   : > { %v1342_v26 = vsel %vm756_vm5, %v2215_v25, 0.0 }
 0xaa7   : > { %1343 = vadd.xlane.f32.xlu2 %v1342_v26 }
 0xab2   : > { %v1487_v32 = vpop.permute.xlu1 %1486 }
 0xabf   : > { %1375 = vrot.lane.b32.xlu2 %v2751_v11, %s2989_s26 }
 0xac7   : > { %1577 = vrot.lane.b32.xlu2 %v2751_v11, %s2990_s27  ;;  %s1932_s27 = scalar_lea.hbm %s2943_s20, %s2514_s2 }
 0xb1a   : > { %v1344_v27 = vpop.xlane.xlu2 %1343 }
 0xb1b   : > { %2216 = vrcp.f32 %v1344_v27 }
 0xb21   : > { %v2217_v28 = vpop.eup %2216 }
 0xb22   : > { %v1346_v29 = vmul.f32 %v2217_v28, %v2215_v25  ;;  %v1376_v30 = vpop.permute.xlu2 %1375 }
 0xb23   : > { %2063 = vmatpush.xpose.msk.msrb.mxu0 %vm756_vm5, %v1376_v30 }
 0xb24   : > { %2062 = vmatmul.msk.f32.vlgmr.msrb.gmra.mxu1 %vm756_vm5, %v1346_v29 }
 0xb26   : > { %2064 = vmatmul.msk.f32.vlgmr.msrb.gmra.mxu0 %vm756_vm5, %v1374_v16  ;;  %v2058_v16 = vld [vmem:[%s2983_s6 + $0x30] sm:$0xff] }
 0xb27   : > { %2068 = vmatpush.xpose.msk.msra.mxu0 %vm756_vm5, %v1489_v31  ;;  %1571 = vmatpush.msrb.mxu1 %v2058_v16  ;;  %v1715_v31 = vld [vmem:[#allocation2 + $0x38] sm:$0xff] }
 0xb2a   : > { %v1578_v40 = vpop.permute.xlu2 %1577 }
 0xb2e   : > { %2069 = vmatmul.msk.f32.vlgmr.msra.gmra.mxu0 %vm756_vm5, %v1487_v32  ;;  %v1714_v32 = vld [vmem:[#allocation2 + $0x30] sm:$0xff] }
 0xba1   : > { %v1370_v33 = vpop.f32.mrf.mxu1 }
 0xba2   : > { %2067 = vmatmul.msk.f32.vlgmr.msra.gmra.mxu3 %vm756_vm5, %v1370_v33  ;;  %v1713_v33 = vld [vmem:[#allocation2 + $0x28] sm:$0xff] }
 0xba3   : > { %v1398_v35 = vpop.f32.mrf.mxu0 }
 0xba4   : > { %v1401_v36 = vmul.f32 0.35355338, %v1398_v35  ;;  %v1712_v35 = vld [vmem:[#allocation2 + $0x20] sm:$0xff] }
 0xba6   : > { %v1402_v38 = vadd.f32 %v1401_v36, %v2624_v45 }
 0xba8   : > { %v1403_v39 = vsel %vm756_vm5, %v1402_v38, -inf }
 0xba9   : > { %1404 = vmax.xlane.f32.xlu2 %v1403_v39 }
 0xbaa   : > { %2073 = vmatmul.msk.f32.vlgmr.msrb.gmra.mxu3 %vm756_vm5, %v1578_v40 }
 0xbab   : > { %v1511_v41 = vpop.f32.mrf.mxu0 }
 0xbac   : > { %v1514_v42 = vmul.f32 0.35355338, %v1511_v41 }
 0xbae   : > { %v1515_v43 = vadd.f32 %v1514_v42, %v2624_v45 }
 0xbb0   : > { %v1516_v44 = vsel %vm756_vm5, %v1515_v43, -inf }
 0xbb1   : > { %1517 = vmax.xlane.f32.xlu0 %v1516_v44 }
 0xc1c   : > { %v1405_v46 = vpop.xlane.xlu2 %1404 }
 0xc1d   : > { %v1406_v37 = vsub.f32 %v1402_v38, %v1405_v46 }
 0xc1f   : > { %v1407_v47 = vmul.f32 1.442695, %v1406_v37 }
 0xc21   : > { %2218 = vpow2.f32 %v1407_v47 }
 0xc24   : > { %v1518_v48 = vpop.xlane.xlu0 %1517 }
 0xc25   : > { %v1519_v49 = vsub.f32 %v1515_v43, %v1518_v48  ;;  %v1483_v50 = vpop.f32.mrf.mxu3 }
 0xc27   : > { %v2219_v51 = vpop.eup %2218  ;;  %v1520_v52 = vmul.f32 1.442695, %v1519_v49 }
 0xc28   : > { %v1409_v53 = vsel %vm756_vm5, %v2219_v51, 0.0 }
 0xc29   : > { %2220 = vpow2.f32 %v1520_v52  ;;  %1410 = vadd.xlane.f32.xlu2 %v1409_v53  ;;  %v2183_v53 = vld [vmem:[%s2932_s9 + $0x1] ss:$0 sm:$0xff] }
 0xc2d   : > { %v1602_v54 = vpop.f32.mrf.mxu3 }
 0xc2e   : > { %v1605_v55 = vmul.f32 0.35355338, %v1602_v54 }
 0xc2f   : > { %v2221_v56 = vpop.eup %2220 }
 0xc30   : > { %v1522_v57 = vsel %vm756_vm5, %v2221_v56, 0.0  ;;  %v1606_v58 = vadd.f32 %v1605_v55, %v2624_v45 }
 0xc31   : > { %1523 = vadd.xlane.f32.xlu0 %v1522_v57  ;;  %v2087_v57 = vld [vmem:[%s2935_s12 + $0x70] sm:$0xff] }
 0xc32   : > { %v1607_v59 = vsel %vm756_vm5, %v1606_v58, -inf }
 0xc33   : > { %1608 = vmax.xlane.f32.xlu1 %v1607_v59  ;;  %v2085_v59 = vld [vmem:[%s2935_s12 + $0x60] sm:$0xff] }
 0xc41   : > { %1414 = vrot.lane.b32.xlu2 %v2751_v11, %s2991_s0  ;;  %s664_s0 = scalar_lea.vmem [#allocation7], %s663_s1 }
 0xc4c   : > { %1618 = vrot.lane.b32.xlu1 %v2751_v11, %s2992_s30  ;;  %s1934_s30 = sshll.u32 %s664_s0, 4  ;;  %s1935_s30 = int_to_ptr.vmem [resolvable:$true] %s1934_s30 }
 0xc9c   : > { %v1411_v60 = vpop.xlane.xlu2 %1410 }
 0xc9d   : > { %2222 = vrcp.f32 %v1411_v60  ;;  %v2084_v60 = vld [vmem:[%s2935_s12 + $0x58] sm:$0xff] }
 0xca3   : > { %v2223_v61 = vpop.eup %2222 }
 0xca4   : > { %v1413_v62 = vmul.f32 %v2223_v61, %v2219_v51  ;;  %v1415_v63 = vpop.permute.xlu2 %1414  ;;  %v1524_v5 = vpop.xlane.xlu0 %1523  ;;  %v2083_v61 = vld [vmem:[%s2935_s12 + $0x50] sm:$0xff] }
 0xca5   : > { %1435 = vmatpush.msrb.mxu2 %v1415_v63  ;;  %v2081_v63 = vld [vmem:[%s2935_s12 + $0x40] sm:$0xff] }
 0xca6   : > { %2065 = vmatmul.msk.f32.vlgmr.msrb.gmra.mxu2 %vm756_vm5, %v1413_v62  ;;  %v1609_v0 = vpop.xlane.xlu1 %1608  ;;  %v2082_v62 = vld [vmem:[%s2935_s12 + $0x48] sm:$0xff] }
 0xca7   : > { %v1610_v45 = vsub.f32 %v1606_v58, %v1609_v0  ;;  %v2086_v58 = vld [vmem:[%s2935_s12 + $0x68] sm:$0xff]  ;;  %v2184_v0 = vld [vmem:[%s2934_s11 + $0x1] ss:$0 sm:$0xff] }
 0xca9   : > { %v1611_v1 = vmul.f32 1.442695, %v1610_v45 }
 0xcab   : > { %2224 = vpow2.f32 %v1611_v1 }
 0xcb1   : > { %v2225_v2 = vpop.eup %2224 }
 0xcb2   : > { %v1613_v3 = vsel %vm756_vm5, %v2225_v2, 0.0 }
 0xcb3   : > { %1614 = vadd.xlane.f32.xlu0 %v1613_v3 }
 0xcbe   : > { %v1619_v34 = vpop.permute.xlu1 %1618 }
 0xcbf   : > { %1639 = vmatpush.msrb.mxu0 %v1619_v34 }
 0xcc7   : > { %1527 = vrot.lane.b32.xlu0 %v2751_v11, %s2993_s23  ;;  %v2059_v11 = vld [vmem:[%s2983_s6 + $0x38] sm:$0xff]  ;;  %s1936_s23 = sshll.u32 %s1932_s27, 4  ;;  %s1937_s23 = int_to_ptr.hbm [resolvable:$true] %s1936_s23 }
 0xcc8   : > { %s2314_s21 = sshra.s32 %s1937_s23, 4  ;;  %s2315_s21 = int_to_ptr.hbm [resolvable:$true] %s2314_s21 }
 0xcc9   : > { %s2316_s24 = scalar_lea.hbm %s2315_s21, 1  ;;  %p2321_p3 = scmp.lt.s32.totalorder %s2315_s21, %s2943_s20 }
 0xcca   : > { %p2317_p0 = scmp.ne.s32.totalorder %s2315_s21, %s2316_s24  ;;  %p2322_p4 = scmp.lt.s32.totalorder %s2320_s29, %s2316_s24 }
 0xccc   : > { %p2318_p1 = pnand %p2317_p0, %p2531_p5  ;;  %p2323_p7 = por %p2322_p4, %p2321_p3 }
 0xcce   : > { %p2319_p2 = pneg %p2318_p1 }
 0xcd0   : > { %p2324_p8 = pnand %p2323_p7, %p2319_p2 }
 0xd26   : > { %v1615_v6 = vpop.xlane.xlu0 %1614 }
 0xd27   : > { %2226 = vrcp.f32 %v1615_v6 }
 0xd28   : > { %2228 = vrcp.f32 %v1524_v5 }
 0xd29   : > { %v1437_v7 = vpop.f32.mrf.mxu2 }
 0xd2a   : > { %2066 = vmatmul.msk.f32.vlgmr.msra.gmra.mxu1 %vm756_vm5, %v1437_v7 }
 0xd2b   : > { %1736 = vmatpush.msra.mxu1 %v1715_v31 }
 0xd2d   : > { %v2227_v9 = vpop.eup %2226  ;;  %1737 = vmatpush.msra.mxu1 %v1714_v32  ;;  %v1868_v32 = vld [vmem:[#allocation5 + $0x60] sm:$0xff] }
 0xd2e   : > { %v1617_v10 = vmul.f32 %v2227_v9, %v2225_v2  ;;  %v2229_v12 = vpop.eup %2228 }
 0xd2f   : > { %v1526_v13 = vmul.f32 %v2229_v12, %v2221_v56  ;;  %1738 = vmatpush.msra.mxu1 %v1713_v33  ;;  %v2088_v56 = vld [vmem:[%s2935_s12 + $0x78] sm:$0xff]  ;;  %v2185_v12 = vld [vmem:[%s2936_s13 + $0x1] ss:$0 sm:$0xff] }
 0xd30   : > { %2074 = vmatmul.msk.f32.vlgmr.msrb.gmra.mxu0 %vm756_vm5, %v1617_v10  ;;  %1778 = vmatpush.msra.mxu3 %v2088_v56  ;;  %v1858_v56 = vld [vmem:[#allocation5 + $0x10] sm:$0xff] }
 0xd31   : > { %1739 = vmatpush.msra.mxu1 %v1712_v35  ;;  %v1867_v35 = vld [vmem:[#allocation5 + $0x58] sm:$0xff] }
 0xd32   : > { %1779 = vmatpush.msra.mxu3 %v2087_v57  ;;  %v1857_v57 = vld [vmem:[#allocation5 + $0x8] sm:$0xff] }
 0xd34   : > { %1780 = vmatpush.msra.mxu3 %v2086_v58  ;;  %v1856_v58 = vld [vmem:[#allocation5] sm:$0xff] }
 0xd36   : > { %1781 = vmatpush.msra.mxu3 %v2085_v59  ;;  %v1831_v59 = vld [vmem:[%s2940_s17] sm:$0x1] }
 0xd38   : > { %1782 = vmatpush.msra.mxu3 %v2084_v60 }
 0xd39   : > { %v1528_v15 = vpop.permute.xlu0 %1527 }
 0xd3a   : > { %1548 = vmatpush.msra.mxu2 %v1528_v15  ;;  %1783 = vmatpush.msra.mxu3 %v2083_v61 }
 0xd3b   : > { %2070 = vmatmul.msk.f32.vlgmr.msra.gmra.mxu2 %vm756_vm5, %v1526_v13 }
 0xd3c   : > { %1662 = vmatpush.msrb.mxu2 %v2059_v11  ;;  %1784 = vmatpush.msra.mxu3 %v2082_v62 }
 0xd3e   : > { %1785 = vmatpush.msra.mxu3 %v2081_v63  ;;  %v1893_v63 = vlaneseq }
 0xda7   : > { %v1460_v19 = vpop.f32.mrf.mxu1 }
 0xda8   : > { %v1484_v20 = vadd.f32 %v1483_v50, %v1460_v19  ;;  %v2182_v50 = vld [vmem:[%s2931_s8 + $0x1] ss:$0 sm:$0xff]  ;;  %v1830_v19 = vld [vmem:[%s2939_s16 + $0x18] sm:$0xff] }
 0xda9   : > { %1847 = vmatpush.msra.mxu0 %v1830_v19 }
 0xdad   : > { %v1641_v17 = vpop.f32.mrf.mxu0 }
 0xdae   : > { %2075 = vmatmul.msk.f32.vlgmr.msrb.gmra.mxu2 %vm756_vm5, %v1641_v17 }
 0xdbe   : > { %v1550_v18 = vpop.f32.mrf.mxu2 }
 0xdbf   : > { %2071 = vmatmul.msk.f32.vlgmr.msrb.gmra.mxu1 %vm756_vm5, %v1550_v18 }
 0xe31   : > { %v1664_v24 = vpop.f32.mrf.mxu2 }
 0xe3c   : > { %v1573_v21 = vpop.f32.mrf.mxu1 }
 0xe3d   : > { %v1576_v22 = vadd.f32 %v1573_v21, %v1484_v20  ;;  %v1829_v20 = vld [vmem:[%s2939_s16 + $0x10] sm:$0xff]  ;;  %v1828_v21 = vld [vmem:[%s2939_s16 + $0x8] sm:$0xff] }
 0xe3e   : > { %1848 = vmatpush.msra.mxu0 %v1829_v20 }
 0xe3f   : > { %v1667_v25 = vadd.f32 %v1664_v24, %v1576_v22  ;;  %v1827_v22 = vld [vmem:[%s2939_s16] sm:$0xff] }
 0xe40   : > { %1849 = vmatpush.msra.mxu0 %v1828_v21 }
 0xe41   : > { %v1673_v26 = vadd.f32 %v2181_v23, %v1667_v25  ;;  %v1871_v25 = vld [vmem:[#allocation5 + $0x78] sm:$0xff] }
 0xe42   : > { %1850 = vmatpush.msra.mxu0 %v1827_v22  ;;  %1873 = vmatpush.msra.mxu2 %v1871_v25 }
 0xe43   : > { %v1674_v27 = vadd.f32 %v1673_v26, %v2744_v8  ;;  %v1870_v26 = vld [vmem:[#allocation5 + $0x70] sm:$0xff] }
 0xe44   : > { %1874 = vmatpush.msra.mxu2 %v1870_v26 }
 0xe45   : > { %v1679_v28 = vsel %vm675_vm0, %v1674_v27, 0.0  ;;  %v1683_v29 = vmul.f32 %v1674_v27, %v1674_v27 }
 0xe46   : > { %1680 = vadd.xlane.f32.xlu2 %v1679_v28 }
 0xe47   : > { %v1684_v30 = vsel %vm675_vm0, %v1683_v29, 0.0 }
 0xe48   : > { %1685 = vadd.xlane.f32.xlu0 %v1684_v30  ;;  %v1869_v30 = vld [vmem:[#allocation5 + $0x68] sm:$0xff] }
 0xe49   : > { %1875 = vmatpush.msra.mxu2 %v1869_v30 }
 0xe4b   : > { %1876 = vmatpush.msra.mxu2 %v1868_v32 }
 0xe4d   : > { %1877 = vmatpush.msra.mxu2 %v1867_v35 }
 0xeb9   : > { %v1681_v36 = vpop.xlane.xlu2 %1680 }
 0xeba   : > { %v1682_v38 = vmul.f32 %v1681_v36, %v2585_v14  ;;  %v1866_v36 = vld [vmem:[#allocation5 + $0x50] sm:$0xff] }
 0xebb   : > { %v1686_v39 = vpop.xlane.xlu0 %1685  ;;  %1878 = vmatpush.msra.mxu2 %v1866_v36 }
 0xebc   : > { %v1688_v8 = vmul.f32 %v1682_v38, %v1682_v38  ;;  %v1687_v40 = vmul.f32 %v1686_v39, %v2585_v14  ;;  %v1690_v49 = vsub.f32 %v1674_v27, %v1682_v38  ;;  %v1865_v38 = vld [vmem:[#allocation5 + $0x48] sm:$0xff]  ;;  %v1864_v39 = vld [vmem:[#allocation5 + $0x40] sm:$0xff] }
 0xebd   : > { %1879 = vmatpush.msra.mxu2 %v1865_v38 }
 0xebe   : > { %v1689_v41 = vsub.f32 %v1687_v40, %v1688_v8  ;;  %v1863_v40 = vld [vmem:[#allocation5 + $0x38] sm:$0xff] }
 0xebf   : > { %1880 = vmatpush.msra.mxu2 %v1864_v39 }
 0xec0   : > { %v1691_v42 = vadd.f32 1e-05, %v1689_v41 }
 0xec1   : > { %1881 = vmatpush.msra.mxu2 %v1863_v40 }
 0xec2   : > { %2230 = vrsqrt.f32 %v1691_v42  ;;  %vm1698_vm14 = vweird.f32 %v1691_v42 }
 0xec8   : > { %v2231_v43 = vpop.eup %2230 }
 0xec9   : > { %v1693_v44 = vmul.f32 %v2231_v43, %v1691_v42  ;;  %vm1699_vm13 = vweird.f32 %v2231_v43 }
 0xeca   : > { %vm1700_vm15 = vmor %vm1698_vm14, %vm1699_vm13 }
 0xecb   : > { %v1694_v46 = vmul.f32 %v2231_v43, %v1693_v44 }
 0xecd   : > { %v1695_v37 = vmul.f32 0.5, %v1694_v46  ;;  %v1860_v46 = vld [vmem:[#allocation5 + $0x20] sm:$0xff] }
 0xecf   : > { %v1696_v47 = vsub.f32 1.5, %v1695_v37 }
 0xed1   : > { %v1697_v48 = vmul.f32 %v2231_v43, %v1696_v47  ;;  %v1859_v47 = vld [vmem:[#allocation5 + $0x18] sm:$0xff] }
 0xed3   : > { %v1701_v51 = vsel %vm1700_vm15, %v2231_v43, %v1697_v48  ;;  %v1861_v43 = vld [vmem:[#allocation5 + $0x28] sm:$0xff] }
 0xed4   : > { %v1702_v52 = vmul.f32 %v1701_v51, %v1690_v49 }
 0xed6   : > { %v1706_v54 = vmul.f32 %v2182_v50, %v1702_v52  ;;  %v2186_v50 = vld [vmem:[%s2937_s14 + $0x1] ss:$0 sm:$0xff] }
 0xed8   : > { %v1710_v55 = vadd.f32 %v2183_v53, %v1706_v54  ;;  %v2187_v53 = vld [vmem:[%s2938_s15 + $0x1] ss:$0 sm:$0xff] }
 0xeda   : > { %2080 = vmatmul.msk.f32.vlgmr.msra.gmra.mxu1 %vm675_vm0, %v1710_v55 }
 0xf57   : > { %v1741_v45 = vpop.f32.mrf.mxu1 }
 0xf58   : > { %v1742_v1 = vadd.f32 %v2184_v0, %v1741_v45  ;;  %v1894_v0 = vand.u32 127, %v1893_v63  ;;  %v1872_v45 = vld [vmem:[%s2942_s19] sm:$0x1] }
 0xf5a   : > { %v1745_v2 = vmul.f32 0.044715, %v1742_v1  ;;  %v1744_v7 = vmul.f32 0.5, %v1742_v1 }
 0xf5c   : > { %v1746_v3 = vmul.f32 %v1745_v2, %v1742_v1 }
 0xf5e   : > { %v1747_v34 = vmul.f32 %v1746_v3, %v1742_v1 }
 0xf60   : > { %v1748_v4 = vadd.f32 %v1747_v34, %v1742_v1 }
 0xf62   : > { %v1749_v5 = vmul.f32 0.7978846, %v1748_v4 }
 0xf64   : > { %2232 = vtanh.f32 %v1749_v5 }
 0xf6a   : > { %v2233_v6 = vpop.eup %2232 }
 0xf6b   : > { %v1751_v9 = vadd.f32 1.0, %v2233_v6 }
 0xf6d   : > { %v1752_v10 = vmul.f32 %v1751_v9, %v1744_v7 }
 0xf6f   : > { %2090 = vmatmul.msk.f32.vlgmr.msra.gmra.mxu3 %vm1210_vm9, %v1752_v10 }
 0xff2   : > { %v1787_v13 = vpop.f32.mrf.mxu3 }
 0xff3   : > { %v1788_v15 = vadd.f32 %v2185_v12, %v1787_v13 }
 0xff5   : > { %v1790_v11 = vadd.f32 %v1788_v15, %v1710_v55 }
 0xff7   : > { %v1795_v16 = vsel %vm675_vm0, %v1790_v11, 0.0  ;;  %v1799_v17 = vmul.f32 %v1790_v11, %v1790_v11 }
 0xff8   : > { %1796 = vadd.xlane.f32.xlu1 %v1795_v16 }
 0xff9   : > { %v1800_v18 = vsel %vm675_vm0, %v1799_v17, 0.0 }
 0xffa   : > { %1801 = vadd.xlane.f32.xlu2 %v1800_v18 }
0x106b   : > { %v1797_v23 = vpop.xlane.xlu1 %1796 }
0x106c   : > { %v1798_v24 = vmul.f32 %v1797_v23, %v2585_v14 }
0x106d   : > { %v1802_v27 = vpop.xlane.xlu2 %1801 }
0x106e   : > { %v1804_v28 = vmul.f32 %v1798_v24, %v1798_v24  ;;  %v1803_v29 = vmul.f32 %v1802_v27, %v2585_v14  ;;  %v1862_v14 = vld [vmem:[#allocation5 + $0x30] sm:$0xff]  ;;  %v1806_v49 = vsub.f32 %v1790_v11, %v1798_v24 }
0x106f   : > { %1882 = vmatpush.msra.mxu2 %v1862_v14 }
0x1070   : > { %v1805_v31 = vsub.f32 %v1803_v29, %v1804_v28 }
0x1071   : > { %1883 = vmatpush.msra.mxu2 %v1861_v43 }
0x1072   : > { %v1807_v33 = vadd.f32 1e-05, %v1805_v31 }
0x1073   : > { %1884 = vmatpush.msra.mxu2 %v1860_v46 }
0x1074   : > { %2234 = vrsqrt.f32 %v1807_v33  ;;  %vm1814_vm2 = vweird.f32 %v1807_v33 }
0x1075   : > { %1885 = vmatpush.msra.mxu2 %v1859_v47 }
0x1077   : > { %1886 = vmatpush.msra.mxu2 %v1858_v56 }
0x1079   : > { %1887 = vmatpush.msra.mxu2 %v1857_v57 }
0x107a   : > { %v2235_v8 = vpop.eup %2234 }
0x107b   : > { %v1809_v41 = vmul.f32 %v2235_v8, %v1807_v33  ;;  %vm1815_vm1 = vweird.f32 %v2235_v8  ;;  %1888 = vmatpush.msra.mxu2 %v1856_v58 }
0x107c   : > { %vm1816_vm3 = vmor %vm1814_vm2, %vm1815_vm1 }
0x107d   : > { %v1810_v42 = vmul.f32 %v2235_v8, %v1809_v41 }
0x107f   : > { %v1811_v44 = vmul.f32 0.5, %v1810_v42 }
0x1081   : > { %v1812_v37 = vsub.f32 1.5, %v1811_v44 }
0x1083   : > { %v1813_v48 = vmul.f32 %v2235_v8, %v1812_v37 }
0x1085   : > { %v1817_v51 = vsel %vm1816_vm3, %v2235_v8, %v1813_v48 }
0x1086   : > { %v1818_v52 = vmul.f32 %v1817_v51, %v1806_v49 }
0x1088   : > { %v1822_v54 = vmul.f32 %v2186_v50, %v1818_v52 }
0x108a   : > { %v1826_v55 = vadd.f32 %v2187_v53, %v1822_v54 }
0x108c   : > { %2093 = vmatmul.msk.f32.vlgmr.msra.gmra.mxu0 %vm675_vm0, %v1826_v55  ;;  %vm1895_vm0 = vcmp.lt.s32.totalorder %v1894_v0, 6 }
0x1109   : > { %v1852_v60 = vpop.f32.mrf.mxu0 }
0x110a   : > { %v1853_v61 = vadd.f32 %v1852_v60, %v1831_v59 }
0x110c   : > { %v1855_v62 = vmax.f32 %v1853_v61, 0.0 }
0x110e   : > { %1889 = vmatmul.f32.vlgmr.msra.gmra.mxu2 %v1855_v62 }
0x1191   : > { %v1890_v1 = vpop.f32.mrf.mxu2 }
0x1192   : > { %v1891_v2 = vadd.f32 %v1890_v1, %v1872_v45 }
0x1194   : > { %v1896_v3 = vsel %vm1895_vm0, %v1891_v2, -1e+30 }
0x1195   : > { %v1898_v34 = vsel %vm1897_vm4, %v1896_v3, -inf }
0x1196   : > { %1899 = vmax.xlane.f32.xlu2 %v1898_v34 }
0x1209   : > { %v1900_v4 = vpop.xlane.xlu2 %1899 }
0x120a   : > { %v1901_v5 = vsub.f32 %v1896_v3, %v1900_v4 }
0x120c   : > { %v1902_v6 = vmul.f32 1.442695, %v1901_v5 }
0x120e   : > { %2236 = vpow2.f32 %v1902_v6 }
0x1214   : > { %v2237_v7 = vpop.eup %2236 }
0x1215   : > { %v1904_v9 = vsel %vm1897_vm4, %v2237_v7, 0.0 }
0x1216   : > { %1905 = vadd.xlane.f32.xlu0 %v1904_v9 }
0x1289   : > { %v1906_v10 = vpop.xlane.xlu0 %1905 }
0x128a   : > { %2238 = vrcp.f32 %v1906_v10  ;;  %v1918_v11 = vand.u32 2147483648, %v1906_v10  ;;  %v1916_v17 = vand.u32 2147483647, %v1906_v10  ;;  %vm1912_vm6 = vweird.f32 %v1906_v10 }
0x128c   : > { %v1919_v19 = vor.u32 1.1754944e-38, %v1918_v11  ;;  %vm1917_vm8 = vcmp.eq.f32.partialorder %v1916_v17, 8.507059e+37 }
0x1290   : > { %v2239_v12 = vpop.eup %2238 }
0x1291   : > { %v1908_v13 = vmul.f32 %v2239_v12, %v1906_v10  ;;  %vm1913_vm5 = vweird.f32 %v2239_v12 }
0x1292   : > { %vm1914_vm7 = vmor %vm1912_vm6, %vm1913_vm5 }
0x1293   : > { %v1909_v15 = vsub.f32 1.0, %v1908_v13 }
0x1295   : > { %v1910_v16 = vmul.f32 %v2239_v12, %v1909_v15 }
0x1297   : > { %v1911_v18 = vadd.f32 %v2239_v12, %v1910_v16 }
0x1299   : > { %v1915_v20 = vsel %vm1914_vm7, %v2239_v12, %v1911_v18 }
0x129a   : > { %v1920_v21 = vsel %vm1917_vm8, %v1919_v19, %v1915_v20 }
0x129b   : > { %v1921_v22 = vmul.f32 %v2237_v7, %v1920_v21 }
0x129d   : > { %1922 = vst [vmem:[%s664_s0] sm:$0x1] %v1921_v22 }
0x129e   : > { %2327 = shalt.err (!%p2324_p8)
}
0x129f   : > { %2104 = dma.vmem_to_hbm [thread:$0]  (%p2531_p5), %s1935_s30, 16, %s1937_s23, %s1924_s28  }
0x12a0 PF: > { %s2994_s1 = sld [smem:[#allocation13_spill]] }
0x12a1   : > { %s2995_s0 = sld [smem:[#allocation11_spill]] }
0x12a6   : > { %p2121_p9 = scmp.ge.s32.totalorder %s2994_s1, 2 }
0x12a7   : > { %s1948_s6 = sand.u32 1, %s2995_s0  }
0x12a8   : > { %p2114_p10 = pnand %p2121_p9, %p2535_p6  ;;  %s1949_s2 = scalar_lea.sflag [#allocation4], %s1948_s6 }
0x12aa   : > { %p2115_p11 = pneg %p2114_p10 }
0x12ac   : > { %2353 = dma.done.wait (%p2115_p11), %s1949_s2, 16  }
0x12ad   : > { %2355 = vsyncadd (%p2115_p11), %s1949_s2, 4294967280  ;;  %s2997_s24 = sld [smem:[#allocation14_spill]]  ;;  %s3000_s1 = smov %s2362_s22 }
0x12ae   : > { %s2998_s21 = sld [smem:[#allocation12_spill]] }
0x12af   : > { %s2999_s23 = sld [smem:[#allocation15_spill]] }
0x12b3   : > { %p32_p12 = scmp.ge.s32.totalorder %s2997_s24, 4  }
0x12b4   : > { %s3001_s22 = smov %s2998_s21 }
0x12b5   :  { %34 = sbr.rel (!%p32_p12) target bundleno = 13 (0xd), region = 159 }
0x12ba   :  { %1954 = vsyncpa [#allocation3], 1 }
0x12bb   :  { %1956 = vsyncpa [#allocation3 + $0x1], 1 }
0x12bc   :  { %1957 = vsyncpa [#allocation6], 1 }
0x12bd   :  { %1958 = vsyncpa [#allocation4], 1 }
0x12be   :  { %1960 = vsyncpa [#allocation4 + $0x1], 1 }

</bundles_post_ra>
